<compile_context>
chip_gen: v5e
topology: v5e:2x2
jax: 0.10.0
libtpu: 0.0.40
codegen_flags: <defaults>
</compile_context>

<pallas_src>
import math

import jax
import jax.numpy as jnp
from jax import lax
from jax.experimental import pallas as pl
from jax.experimental.pallas import tpu as pltpu

KSIZE = 7
PAD = 3  # kernel_size=7 -> padding=3 ("same" conv)


def _tree_sum(terms):
    """Pairwise tree add (shorter FP dependency chains -> better VALU slot fill)."""
    terms = list(terms)
    while len(terms) > 1:
        nxt = [terms[i] + terms[i + 1] for i in range(0, len(terms) - 1, 2)]
        if len(terms) % 2:
            nxt.append(terms[-1])
        terms = nxt
    return terms[0]


def _make_kernel(C, H, W):
    HW = H * W
    EXT = HW + 6 * W            # flat domain covering padded rows [-3, H+3)
    S = 3 * W + 3               # zero padding on each side of the flat map
    PADLEN = HW + 2 * S

    def kernel(w_ref, mask_ref, x_ref, o_ref, pmap_ref, g_ref):
        # w_ref   : (98,)  f32 SMEM  - conv weight, scalar prefetch
        # mask_ref: (7,EXT) f32 VMEM - per-dw column validity masks (0/1)
        # x_ref   : (TB, C, H*W)     - lane-dense flat input block
        # o_ref   : (TB, 1, H*W)     - lane-dense flat output block
        # pmap_ref: (2, TB, PADLEN) f32 scratch - zero-padded avg/max maps
        # g_ref   : (TB, EXT) f32 scratch       - per-dh conv accumulator
        tb = x_ref.shape[0]

        # ---- fused single-pass channel reduction (running sum + max) ----
        x0 = x_ref[:, 0, :]
        s = x0.astype(jnp.float32)
        mx = x0
        if C <= 64:
            for c in range(1, C):
                xc = x_ref[:, c, :]
                s = s + xc.astype(jnp.float32)
                mx = jnp.maximum(mx, xc)
        else:
            def body(c, carry):
                s_, m_ = carry
                xc = x_ref[:, c, :]
                return s_ + xc.astype(jnp.float32), jnp.maximum(m_, xc)
            s, mx = lax.fori_loop(1, C, body, (s, mx))
        avg = s * jnp.float32(1.0 / C)
        mxf = mx.astype(jnp.float32)

        # ---- zero-padded flat maps in VMEM scratch (pads re-zeroed each
        # step so megacore-sharded grid steps never see stale data) ----
        zpad = jnp.zeros((2, tb, S), jnp.float32)
        pmap_ref[:, :, :S] = zpad
        pmap_ref[:, :, S + HW:] = zpad
        pmap_ref[0, :, S:S + HW] = avg
        pmap_ref[1, :, S:S + HW] = mxf

        # ---- hoisted, column-masked lane shifts: 7 per map, reused by all dh
        u = []
        for ci in range(2):
            row = []
            for dw in range(KSIZE):
                t = pmap_ref[ci, :, dw:dw + EXT]            # shifted (TB, EXT)
                if dw != PAD:                               # center tap: all valid
                    t = t * mask_ref[dw:dw + 1, :]          # zero cross-row taps
                row.append(t)
            u.append(row)

        # ---- 2-channel 7x7 "same" conv (cross-correlation, zero pad, no bias)
        row_terms = []
        for dh in range(KSIZE):
            parts = []
            for ci in range(2):
                base = ci * KSIZE * KSIZE + dh * KSIZE
                parts.append(_tree_sum(
                    [w_ref[base + dw] * u[ci][dw] for dw in range(KSIZE)]))
            g_ref[...] = parts[0] + parts[1]                # (TB, EXT)
            row_terms.append(g_ref[:, dh * W:dh * W + HW])  # output rows for dh
        acc = _tree_sum(row_terms)                          # (TB, HW) f32

        o_ref[:, 0, :] = jax.nn.sigmoid(acc).astype(o_ref.dtype)

    return kernel, EXT, PADLEN


def _vmem_policy():
    """(per-step VMEM budget, vmem_limit_bytes, treat-as-multi-TensorCore)."""
    try:
        cap = int(pltpu.get_tpu_info().vmem_capacity_bytes)
    except Exception:
        cap = 64 << 20                              # conservative (v7x-sized)
    if cap <= (64 << 20):                           # v7x: 64 MiB per TC
        budget, limit, multi = 44 << 20, 52 << 20, True
    else:                                           # v5e / v6e: 128 MiB
        budget, limit, multi = 96 << 20, 104 << 20, False
    budget = min(budget, max(cap - (16 << 20), cap // 2))
    limit = min(limit, max(cap - (8 << 20), cap // 2))
    return budget, limit, multi


def _block_cost(tb, c, h, w, itemsize):
    """Per-grid-step VMEM footprint: double-buffered blocks + masks + scratch +
    the in-kernel f32 temporaries (14 hoisted shifted tiles etc.) that spill."""
    hw = h * w
    ext = hw + 6 * w
    padlen = hw + 2 * (3 * w + 3)
    f32 = 4
    in_blk = tb * c * hw * itemsize
    out_blk = tb * hw * itemsize
    masks = KSIZE * ext * f32
    scratch = (2 * tb * padlen + tb * ext) * f32
    temps = tb * f32 * (18 * ext + 12 * hw)
    return 2 * (in_blk + out_blk + masks) + scratch + temps + (1 << 20)


def _pick_tb(n, cost_fn, budget, prefer_even_steps):
    """Largest batch tile (divisor of n) fitting the budget; on 2-TC parts
    prefer an even number of grid steps (>= 2) for megacore load balance."""
    divisors = [t for t in range(1, n + 1) if n % t == 0]
    feasible = [t for t in divisors if cost_fn(t) <= budget]
    if not feasible:
        # TODO(synk): channel-tile grid axis for huge C*H*W instead of this.
        return 1
    if prefer_even_steps and n >= 2:
        for pred in (lambda t: (n // t) >= 2 and (n // t) % 2 == 0,
                     lambda t: (n // t) >= 2):
            cands = [t for t in feasible if pred(t)]
            if cands:
                return max(cands)
    return max(feasible)


@jax.jit
def spatial_attention(x, w):
    """x: (N, C, H, W); w: (2, 7, 7) = Conv2d(2,1,7,bias=False) weight (out ch squeezed)."""
    n, c, h, wd = x.shape
    hw = h * wd
    itemsize = jnp.dtype(x.dtype).itemsize

    budget, vmem_limit, multi_tc = _vmem_policy()
    tb = _pick_tb(n, lambda t: _block_cost(t, c, h, wd, itemsize), budget, multi_tc)

    kernel, ext, padlen = _make_kernel(c, h, wd)

    # Column-validity masks (0/1 floats) for each dw tap; shared by both
    # channels and all dh (computed once outside the kernel).
    col = jnp.arange(ext, dtype=jnp.int32) % wd
    masks = jnp.stack(
        [((col >= PAD - dw) & (col < wd + PAD - dw)).astype(jnp.float32)
         for dw in range(KSIZE)], axis=0)                    # (7, EXT)

    w_flat = w.astype(jnp.float32).reshape(-1)               # (98,) -> SMEM scalars
    x_flat = x.reshape(n, c, hw)                             # free view: lane-dense

    out = pl.pallas_call(
        kernel,
        out_shape=jax.ShapeDtypeStruct((n, 1, hw), x.dtype),
        grid_spec=pltpu.PrefetchScalarGridSpec(
            num_scalar_prefetch=1,
            grid=(n // tb,),
            in_specs=[
                pl.BlockSpec((KSIZE, ext), lambda b, wref: (0, 0)),
                pl.BlockSpec((tb, c, hw), lambda b, wref: (b, 0, 0)),
            ],
            out_specs=pl.BlockSpec((tb, 1, hw), lambda b, wref: (b, 0, 0)),
            scratch_shapes=[
                pltpu.VMEM((2, tb, padlen), jnp.float32),   # padded avg/max maps
                pltpu.VMEM((tb, ext), jnp.float32),         # per-dh conv rows
            ],
        ),
        compiler_params=pltpu.CompilerParams(
            dimension_semantics=("parallel",),
            vmem_limit_bytes=int(vmem_limit),
        ),
    )(w_flat, masks, x_flat)
    return out.reshape(n, 1, h, wd)


def _reference(x, w):
    # Pure-JAX reference of the PyTorch forward (sanity check).
    avg_out = jnp.mean(x, axis=1, keepdims=True)
    max_out = jnp.max(x, axis=1, keepdims=True)
    cat = jnp.concatenate([avg_out, max_out], axis=1)        # (N, 2, H, W)
    out = lax.conv_general_dilated(
        cat, w[None],                                        # (1, 2, 7, 7) OIHW
        window_strides=(1, 1), padding=((PAD, PAD), (PAD, PAD)),
        dimension_numbers=("NCHW", "OIHW", "NCHW"),
    )
    return jax.nn.sigmoid(out)


if __name__ == "__main__":
    key = jax.random.PRNGKey(0)
    kx, kw = jax.random.split(key)

    N, C, H, W = 2, 4, 16, 16
    x = jax.random.normal(kx, (N, C, H, W), dtype=jnp.float32)

    # Deterministic Conv2d(2, 1, 7, bias=False) weight (kaiming-uniform-style bound).
    fan_in = 2 * KSIZE * KSIZE
    bound = 1.0 / math.sqrt(float(fan_in))
    w = jax.random.uniform(kw, (2, KSIZE, KSIZE), dtype=jnp.float32,
                           minval=-bound, maxval=bound)

    out = jax.block_until_ready(spatial_attention(x, w))

    ref = _reference(x, w)
    assert out.shape == (N, 1, H, W)
    assert jnp.allclose(out, ref, atol=1e-5, rtol=1e-5)

    print("KERNEL_OK")
</pallas_src>

<mosaic_0001>
module attributes {stable_mosaic.version = 11 : i64} {
  func.func @kernel(%arg0: i32, %arg1: memref<98xf32, #tpu.memory_space<smem>>, %arg2: memref<7x352xf32, #tpu.memory_space<vmem>>, %arg3: memref<1x4x256xf32, #tpu.memory_space<vmem>>, %arg4: memref<1x1x256xf32, #tpu.memory_space<vmem>>, %arg5: memref<2x1x358xf32, #tpu.memory_space<vmem>>, %arg6: memref<1x352xf32, #tpu.memory_space<vmem>>) attributes {dimension_semantics = [#tpu.dimension_semantics<parallel>], iteration_bounds = array<i64: 2>, scalar_prefetch = 1 : i64, scratch_operands = 2 : i64, tpu.core_type = #tpu.core_type<tc>, window_params = [{pipeline_mode = #tpu.pipeline_mode<synchronous>, transform_indices = @transform_0, window_bounds = array<i64: 7, 352>}, {transform_indices = @transform_1, window_bounds = array<i64: 1, 4, 256>}, {transform_indices = @transform_2, window_bounds = array<i64: 1, 1, 256>}]} {
    %c0 = arith.constant 0 : index
    %c0_0 = arith.constant 0 : index
    %c0_1 = arith.constant 0 : index
    %0 = vector.load %arg3[%c0, %c0_0, %c0_1] : memref<1x4x256xf32, #tpu.memory_space<vmem>>, vector<1x1x256xf32>
    %1 = vector.shape_cast %0 : vector<1x1x256xf32> to vector<1x256xf32>
    %c0_2 = arith.constant 0 : index
    %c1 = arith.constant 1 : index
    %c0_3 = arith.constant 0 : index
    %2 = vector.load %arg3[%c0_2, %c1, %c0_3] : memref<1x4x256xf32, #tpu.memory_space<vmem>>, vector<1x1x256xf32>
    %3 = vector.shape_cast %2 : vector<1x1x256xf32> to vector<1x256xf32>
    %4 = arith.addf %1, %3 : vector<1x256xf32>
    %5 = arith.maximumf %1, %3 : vector<1x256xf32>
    %c0_4 = arith.constant 0 : index
    %c2 = arith.constant 2 : index
    %c0_5 = arith.constant 0 : index
    %6 = vector.load %arg3[%c0_4, %c2, %c0_5] : memref<1x4x256xf32, #tpu.memory_space<vmem>>, vector<1x1x256xf32>
    %7 = vector.shape_cast %6 : vector<1x1x256xf32> to vector<1x256xf32>
    %8 = arith.addf %4, %7 : vector<1x256xf32>
    %9 = arith.maximumf %5, %7 : vector<1x256xf32>
    %c0_6 = arith.constant 0 : index
    %c3 = arith.constant 3 : index
    %c0_7 = arith.constant 0 : index
    %10 = vector.load %arg3[%c0_6, %c3, %c0_7] : memref<1x4x256xf32, #tpu.memory_space<vmem>>, vector<1x1x256xf32>
    %11 = vector.shape_cast %10 : vector<1x1x256xf32> to vector<1x256xf32>
    %12 = arith.addf %8, %11 : vector<1x256xf32>
    %13 = arith.maximumf %9, %11 : vector<1x256xf32>
    %cst = arith.constant 2.500000e-01 : f32
    %14 = vector.broadcast %cst : f32 to vector<1x256xf32>
    %15 = arith.mulf %12, %14 : vector<1x256xf32>
    %cst_8 = arith.constant 0.000000e+00 : f32
    %16 = vector.broadcast %cst_8 : f32 to vector<2x1x51xf32>
    %c0_9 = arith.constant 0 : index
    %c0_10 = arith.constant 0 : index
    %c0_11 = arith.constant 0 : index
    %17 = vector.load %arg5[%c0_9, %c0_10, %c0_11] : memref<2x1x358xf32, #tpu.memory_space<vmem>>, vector<2x1x51xf32>
    tpu.vector_store %arg5[%c0_9, %c0_10, %c0_11], %16 {strides = array<i32>} : memref<2x1x358xf32, #tpu.memory_space<vmem>>, vector<2x1x51xf32>,
    %c0_12 = arith.constant 0 : index
    %c0_13 = arith.constant 0 : index
    %c307 = arith.constant 307 : index
    %18 = vector.load %arg5[%c0_12, %c0_13, %c307] : memref<2x1x358xf32, #tpu.memory_space<vmem>>, vector<2x1x51xf32>
    tpu.vector_store %arg5[%c0_12, %c0_13, %c307], %16 {strides = array<i32>} : memref<2x1x358xf32, #tpu.memory_space<vmem>>, vector<2x1x51xf32>,
    %c0_14 = arith.constant 0 : index
    %c0_15 = arith.constant 0 : index
    %c51 = arith.constant 51 : index
    %19 = vector.load %arg5[%c0_14, %c0_15, %c51] : memref<2x1x358xf32, #tpu.memory_space<vmem>>, vector<1x1x256xf32>
    %20 = vector.shape_cast %19 : vector<1x1x256xf32> to vector<1x256xf32>
    %21 = vector.shape_cast %15 : vector<1x256xf32> to vector<1x1x256xf32>
    tpu.vector_store %arg5[%c0_14, %c0_15, %c51], %21 {strides = array<i32>} : memref<2x1x358xf32, #tpu.memory_space<vmem>>, vector<1x1x256xf32>,
    %c1_16 = arith.constant 1 : index
    %c0_17 = arith.constant 0 : index
    %c51_18 = arith.constant 51 : index
    %22 = vector.load %arg5[%c1_16, %c0_17, %c51_18] : memref<2x1x358xf32, #tpu.memory_space<vmem>>, vector<1x1x256xf32>
    %23 = vector.shape_cast %22 : vector<1x1x256xf32> to vector<1x256xf32>
    %24 = vector.shape_cast %13 : vector<1x256xf32> to vector<1x1x256xf32>
    tpu.vector_store %arg5[%c1_16, %c0_17, %c51_18], %24 {strides = array<i32>} : memref<2x1x358xf32, #tpu.memory_space<vmem>>, vector<1x1x256xf32>,
    %c0_19 = arith.constant 0 : index
    %c0_20 = arith.constant 0 : index
    %c0_21 = arith.constant 0 : index
    %25 = vector.load %arg5[%c0_19, %c0_20, %c0_21] : memref<2x1x358xf32, #tpu.memory_space<vmem>>, vector<1x1x352xf32>
    %26 = vector.shape_cast %25 : vector<1x1x352xf32> to vector<1x352xf32>
    %c0_22 = arith.constant 0 : index
    %c0_23 = arith.constant 0 : index
    %27 = vector.load %arg2[%c0_22, %c0_23] : memref<7x352xf32, #tpu.memory_space<vmem>>, vector<1x352xf32>
    %28 = arith.mulf %26, %27 : vector<1x352xf32>
    %c0_24 = arith.constant 0 : index
    %c0_25 = arith.constant 0 : index
    %c1_26 = arith.constant 1 : index
    %29 = vector.load %arg5[%c0_24, %c0_25, %c1_26] : memref<2x1x358xf32, #tpu.memory_space<vmem>>, vector<1x1x352xf32>
    %30 = vector.shape_cast %29 : vector<1x1x352xf32> to vector<1x352xf32>
    %c1_27 = arith.constant 1 : index
    %c0_28 = arith.constant 0 : index
    %31 = vector.load %arg2[%c1_27, %c0_28] : memref<7x352xf32, #tpu.memory_space<vmem>>, vector<1x352xf32>
    %32 = arith.mulf %30, %31 : vector<1x352xf32>
    %c0_29 = arith.constant 0 : index
    %c0_30 = arith.constant 0 : index
    %c2_31 = arith.constant 2 : index
    %33 = vector.load %arg5[%c0_29, %c0_30, %c2_31] : memref<2x1x358xf32, #tpu.memory_space<vmem>>, vector<1x1x352xf32>
    %34 = vector.shape_cast %33 : vector<1x1x352xf32> to vector<1x352xf32>
    %c2_32 = arith.constant 2 : index
    %c0_33 = arith.constant 0 : index
    %35 = vector.load %arg2[%c2_32, %c0_33] : memref<7x352xf32, #tpu.memory_space<vmem>>, vector<1x352xf32>
    %36 = arith.mulf %34, %35 : vector<1x352xf32>
    %c0_34 = arith.constant 0 : index
    %c0_35 = arith.constant 0 : index
    %c3_36 = arith.constant 3 : index
    %37 = vector.load %arg5[%c0_34, %c0_35, %c3_36] : memref<2x1x358xf32, #tpu.memory_space<vmem>>, vector<1x1x352xf32>
    %38 = vector.shape_cast %37 : vector<1x1x352xf32> to vector<1x352xf32>
    %c0_37 = arith.constant 0 : index
    %c0_38 = arith.constant 0 : index
    %c4 = arith.constant 4 : index
    %39 = vector.load %arg5[%c0_37, %c0_38, %c4] : memref<2x1x358xf32, #tpu.memory_space<vmem>>, vector<1x1x352xf32>
    %40 = vector.shape_cast %39 : vector<1x1x352xf32> to vector<1x352xf32>
    %c4_39 = arith.constant 4 : index
    %c0_40 = arith.constant 0 : index
    %41 = vector.load %arg2[%c4_39, %c0_40] : memref<7x352xf32, #tpu.memory_space<vmem>>, vector<1x352xf32>
    %42 = arith.mulf %40, %41 : vector<1x352xf32>
    %c0_41 = arith.constant 0 : index
    %c0_42 = arith.constant 0 : index
    %c5 = arith.constant 5 : index
    %43 = vector.load %arg5[%c0_41, %c0_42, %c5] : memref<2x1x358xf32, #tpu.memory_space<vmem>>, vector<1x1x352xf32>
    %44 = vector.shape_cast %43 : vector<1x1x352xf32> to vector<1x352xf32>
    %c5_43 = arith.constant 5 : index
    %c0_44 = arith.constant 0 : index
    %45 = vector.load %arg2[%c5_43, %c0_44] : memref<7x352xf32, #tpu.memory_space<vmem>>, vector<1x352xf32>
    %46 = arith.mulf %44, %45 : vector<1x352xf32>
    %c0_45 = arith.constant 0 : index
    %c0_46 = arith.constant 0 : index
    %c6 = arith.constant 6 : index
    %47 = vector.load %arg5[%c0_45, %c0_46, %c6] : memref<2x1x358xf32, #tpu.memory_space<vmem>>, vector<1x1x352xf32>
    %48 = vector.shape_cast %47 : vector<1x1x352xf32> to vector<1x352xf32>
    %c6_47 = arith.constant 6 : index
    %c0_48 = arith.constant 0 : index
    %49 = vector.load %arg2[%c6_47, %c0_48] : memref<7x352xf32, #tpu.memory_space<vmem>>, vector<1x352xf32>
    %50 = arith.mulf %48, %49 : vector<1x352xf32>
    %c1_49 = arith.constant 1 : index
    %c0_50 = arith.constant 0 : index
    %c0_51 = arith.constant 0 : index
    %51 = vector.load %arg5[%c1_49, %c0_50, %c0_51] : memref<2x1x358xf32, #tpu.memory_space<vmem>>, vector<1x1x352xf32>
    %52 = vector.shape_cast %51 : vector<1x1x352xf32> to vector<1x352xf32>
    %c0_52 = arith.constant 0 : index
    %c0_53 = arith.constant 0 : index
    %53 = vector.load %arg2[%c0_52, %c0_53] : memref<7x352xf32, #tpu.memory_space<vmem>>, vector<1x352xf32>
    %54 = arith.mulf %52, %53 : vector<1x352xf32>
    %c1_54 = arith.constant 1 : index
    %c0_55 = arith.constant 0 : index
    %c1_56 = arith.constant 1 : index
    %55 = vector.load %arg5[%c1_54, %c0_55, %c1_56] : memref<2x1x358xf32, #tpu.memory_space<vmem>>, vector<1x1x352xf32>
    %56 = vector.shape_cast %55 : vector<1x1x352xf32> to vector<1x352xf32>
    %c1_57 = arith.constant 1 : index
    %c0_58 = arith.constant 0 : index
    %57 = vector.load %arg2[%c1_57, %c0_58] : memref<7x352xf32, #tpu.memory_space<vmem>>, vector<1x352xf32>
    %58 = arith.mulf %56, %57 : vector<1x352xf32>
    %c1_59 = arith.constant 1 : index
    %c0_60 = arith.constant 0 : index
    %c2_61 = arith.constant 2 : index
    %59 = vector.load %arg5[%c1_59, %c0_60, %c2_61] : memref<2x1x358xf32, #tpu.memory_space<vmem>>, vector<1x1x352xf32>
    %60 = vector.shape_cast %59 : vector<1x1x352xf32> to vector<1x352xf32>
    %c2_62 = arith.constant 2 : index
    %c0_63 = arith.constant 0 : index
    %61 = vector.load %arg2[%c2_62, %c0_63] : memref<7x352xf32, #tpu.memory_space<vmem>>, vector<1x352xf32>
    %62 = arith.mulf %60, %61 : vector<1x352xf32>
    %c1_64 = arith.constant 1 : index
    %c0_65 = arith.constant 0 : index
    %c3_66 = arith.constant 3 : index
    %63 = vector.load %arg5[%c1_64, %c0_65, %c3_66] : memref<2x1x358xf32, #tpu.memory_space<vmem>>, vector<1x1x352xf32>
    %64 = vector.shape_cast %63 : vector<1x1x352xf32> to vector<1x352xf32>
    %c1_67 = arith.constant 1 : index
    %c0_68 = arith.constant 0 : index
    %c4_69 = arith.constant 4 : index
    %65 = vector.load %arg5[%c1_67, %c0_68, %c4_69] : memref<2x1x358xf32, #tpu.memory_space<vmem>>, vector<1x1x352xf32>
    %66 = vector.shape_cast %65 : vector<1x1x352xf32> to vector<1x352xf32>
    %c4_70 = arith.constant 4 : index
    %c0_71 = arith.constant 0 : index
    %67 = vector.load %arg2[%c4_70, %c0_71] : memref<7x352xf32, #tpu.memory_space<vmem>>, vector<1x352xf32>
    %68 = arith.mulf %66, %67 : vector<1x352xf32>
    %c1_72 = arith.constant 1 : index
    %c0_73 = arith.constant 0 : index
    %c5_74 = arith.constant 5 : index
    %69 = vector.load %arg5[%c1_72, %c0_73, %c5_74] : memref<2x1x358xf32, #tpu.memory_space<vmem>>, vector<1x1x352xf32>
    %70 = vector.shape_cast %69 : vector<1x1x352xf32> to vector<1x352xf32>
    %c5_75 = arith.constant 5 : index
    %c0_76 = arith.constant 0 : index
    %71 = vector.load %arg2[%c5_75, %c0_76] : memref<7x352xf32, #tpu.memory_space<vmem>>, vector<1x352xf32>
    %72 = arith.mulf %70, %71 : vector<1x352xf32>
    %c1_77 = arith.constant 1 : index
    %c0_78 = arith.constant 0 : index
    %c6_79 = arith.constant 6 : index
    %73 = vector.load %arg5[%c1_77, %c0_78, %c6_79] : memref<2x1x358xf32, #tpu.memory_space<vmem>>, vector<1x1x352xf32>
    %74 = vector.shape_cast %73 : vector<1x1x352xf32> to vector<1x352xf32>
    %c6_80 = arith.constant 6 : index
    %c0_81 = arith.constant 0 : index
    %75 = vector.load %arg2[%c6_80, %c0_81] : memref<7x352xf32, #tpu.memory_space<vmem>>, vector<1x352xf32>
    %76 = arith.mulf %74, %75 : vector<1x352xf32>
    %c0_82 = arith.constant 0 : index
    %77 = memref.load %arg1[%c0_82] : memref<98xf32, #tpu.memory_space<smem>>
    %78 = vector.broadcast %77 : f32 to vector<1x352xf32>
    %79 = arith.mulf %78, %28 : vector<1x352xf32>
    %c1_83 = arith.constant 1 : index
    %80 = memref.load %arg1[%c1_83] : memref<98xf32, #tpu.memory_space<smem>>
    %81 = vector.broadcast %80 : f32 to vector<1x352xf32>
    %82 = arith.mulf %81, %32 : vector<1x352xf32>
    %c2_84 = arith.constant 2 : index
    %83 = memref.load %arg1[%c2_84] : memref<98xf32, #tpu.memory_space<smem>>
    %84 = vector.broadcast %83 : f32 to vector<1x352xf32>
    %85 = arith.mulf %84, %36 : vector<1x352xf32>
    %c3_85 = arith.constant 3 : index
    %86 = memref.load %arg1[%c3_85] : memref<98xf32, #tpu.memory_space<smem>>
    %87 = vector.broadcast %86 : f32 to vector<1x352xf32>
    %88 = arith.mulf %87, %38 : vector<1x352xf32>
    %c4_86 = arith.constant 4 : index
    %89 = memref.load %arg1[%c4_86] : memref<98xf32, #tpu.memory_space<smem>>
    %90 = vector.broadcast %89 : f32 to vector<1x352xf32>
    %91 = arith.mulf %90, %42 : vector<1x352xf32>
    %c5_87 = arith.constant 5 : index
    %92 = memref.load %arg1[%c5_87] : memref<98xf32, #tpu.memory_space<smem>>
    %93 = vector.broadcast %92 : f32 to vector<1x352xf32>
    %94 = arith.mulf %93, %46 : vector<1x352xf32>
    %c6_88 = arith.constant 6 : index
    %95 = memref.load %arg1[%c6_88] : memref<98xf32, #tpu.memory_space<smem>>
    %96 = vector.broadcast %95 : f32 to vector<1x352xf32>
    %97 = arith.mulf %96, %50 : vector<1x352xf32>
    %98 = arith.addf %79, %82 : vector<1x352xf32>
    %99 = arith.addf %85, %88 : vector<1x352xf32>
    %100 = arith.addf %91, %94 : vector<1x352xf32>
    %101 = arith.addf %98, %99 : vector<1x352xf32>
    %102 = arith.addf %100, %97 : vector<1x352xf32>
    %103 = arith.addf %101, %102 : vector<1x352xf32>
    %c49 = arith.constant 49 : index
    %104 = memref.load %arg1[%c49] : memref<98xf32, #tpu.memory_space<smem>>
    %105 = vector.broadcast %104 : f32 to vector<1x352xf32>
    %106 = arith.mulf %105, %54 : vector<1x352xf32>
    %c50 = arith.constant 50 : index
    %107 = memref.load %arg1[%c50] : memref<98xf32, #tpu.memory_space<smem>>
    %108 = vector.broadcast %107 : f32 to vector<1x352xf32>
    %109 = arith.mulf %108, %58 : vector<1x352xf32>
    %c51_89 = arith.constant 51 : index
    %110 = memref.load %arg1[%c51_89] : memref<98xf32, #tpu.memory_space<smem>>
    %111 = vector.broadcast %110 : f32 to vector<1x352xf32>
    %112 = arith.mulf %111, %62 : vector<1x352xf32>
    %c52 = arith.constant 52 : index
    %113 = memref.load %arg1[%c52] : memref<98xf32, #tpu.memory_space<smem>>
    %114 = vector.broadcast %113 : f32 to vector<1x352xf32>
    %115 = arith.mulf %114, %64 : vector<1x352xf32>
    %c53 = arith.constant 53 : index
    %116 = memref.load %arg1[%c53] : memref<98xf32, #tpu.memory_space<smem>>
    %117 = vector.broadcast %116 : f32 to vector<1x352xf32>
    %118 = arith.mulf %117, %68 : vector<1x352xf32>
    %c54 = arith.constant 54 : index
    %119 = memref.load %arg1[%c54] : memref<98xf32, #tpu.memory_space<smem>>
    %120 = vector.broadcast %119 : f32 to vector<1x352xf32>
    %121 = arith.mulf %120, %72 : vector<1x352xf32>
    %c55 = arith.constant 55 : index
    %122 = memref.load %arg1[%c55] : memref<98xf32, #tpu.memory_space<smem>>
    %123 = vector.broadcast %122 : f32 to vector<1x352xf32>
    %124 = arith.mulf %123, %76 : vector<1x352xf32>
    %125 = arith.addf %106, %109 : vector<1x352xf32>
    %126 = arith.addf %112, %115 : vector<1x352xf32>
    %127 = arith.addf %118, %121 : vector<1x352xf32>
    %128 = arith.addf %125, %126 : vector<1x352xf32>
    %129 = arith.addf %127, %124 : vector<1x352xf32>
    %130 = arith.addf %128, %129 : vector<1x352xf32>
    %131 = arith.addf %103, %130 : vector<1x352xf32>
    %c0_90 = arith.constant 0 : index
    %c0_91 = arith.constant 0 : index
    %132 = vector.load %arg6[%c0_90, %c0_91] : memref<1x352xf32, #tpu.memory_space<vmem>>, vector<1x352xf32>
    tpu.vector_store %arg6[%c0_90, %c0_91], %131 {strides = array<i32>} : memref<1x352xf32, #tpu.memory_space<vmem>>, vector<1x352xf32>,
    %c0_92 = arith.constant 0 : index
    %c0_93 = arith.constant 0 : index
    %133 = vector.load %arg6[%c0_92, %c0_93] : memref<1x352xf32, #tpu.memory_space<vmem>>, vector<1x256xf32>
    %c7 = arith.constant 7 : index
    %134 = memref.load %arg1[%c7] : memref<98xf32, #tpu.memory_space<smem>>
    %135 = vector.broadcast %134 : f32 to vector<1x352xf32>
    %136 = arith.mulf %135, %28 : vector<1x352xf32>
    %c8 = arith.constant 8 : index
    %137 = memref.load %arg1[%c8] : memref<98xf32, #tpu.memory_space<smem>>
    %138 = vector.broadcast %137 : f32 to vector<1x352xf32>
    %139 = arith.mulf %138, %32 : vector<1x352xf32>
    %c9 = arith.constant 9 : index
    %140 = memref.load %arg1[%c9] : memref<98xf32, #tpu.memory_space<smem>>
    %141 = vector.broadcast %140 : f32 to vector<1x352xf32>
    %142 = arith.mulf %141, %36 : vector<1x352xf32>
    %c10 = arith.constant 10 : index
    %143 = memref.load %arg1[%c10] : memref<98xf32, #tpu.memory_space<smem>>
    %144 = vector.broadcast %143 : f32 to vector<1x352xf32>
    %145 = arith.mulf %144, %38 : vector<1x352xf32>
    %c11 = arith.constant 11 : index
    %146 = memref.load %arg1[%c11] : memref<98xf32, #tpu.memory_space<smem>>
    %147 = vector.broadcast %146 : f32 to vector<1x352xf32>
    %148 = arith.mulf %147, %42 : vector<1x352xf32>
    %c12 = arith.constant 12 : index
    %149 = memref.load %arg1[%c12] : memref<98xf32, #tpu.memory_space<smem>>
    %150 = vector.broadcast %149 : f32 to vector<1x352xf32>
    %151 = arith.mulf %150, %46 : vector<1x352xf32>
    %c13 = arith.constant 13 : index
    %152 = memref.load %arg1[%c13] : memref<98xf32, #tpu.memory_space<smem>>
    %153 = vector.broadcast %152 : f32 to vector<1x352xf32>
    %154 = arith.mulf %153, %50 : vector<1x352xf32>
    %155 = arith.addf %136, %139 : vector<1x352xf32>
    %156 = arith.addf %142, %145 : vector<1x352xf32>
    %157 = arith.addf %148, %151 : vector<1x352xf32>
    %158 = arith.addf %155, %156 : vector<1x352xf32>
    %159 = arith.addf %157, %154 : vector<1x352xf32>
    %160 = arith.addf %158, %159 : vector<1x352xf32>
    %c56 = arith.constant 56 : index
    %161 = memref.load %arg1[%c56] : memref<98xf32, #tpu.memory_space<smem>>
    %162 = vector.broadcast %161 : f32 to vector<1x352xf32>
    %163 = arith.mulf %162, %54 : vector<1x352xf32>
    %c57 = arith.constant 57 : index
    %164 = memref.load %arg1[%c57] : memref<98xf32, #tpu.memory_space<smem>>
    %165 = vector.broadcast %164 : f32 to vector<1x352xf32>
    %166 = arith.mulf %165, %58 : vector<1x352xf32>
    %c58 = arith.constant 58 : index
    %167 = memref.load %arg1[%c58] : memref<98xf32, #tpu.memory_space<smem>>
    %168 = vector.broadcast %167 : f32 to vector<1x352xf32>
    %169 = arith.mulf %168, %62 : vector<1x352xf32>
    %c59 = arith.constant 59 : index
    %170 = memref.load %arg1[%c59] : memref<98xf32, #tpu.memory_space<smem>>
    %171 = vector.broadcast %170 : f32 to vector<1x352xf32>
    %172 = arith.mulf %171, %64 : vector<1x352xf32>
    %c60 = arith.constant 60 : index
    %173 = memref.load %arg1[%c60] : memref<98xf32, #tpu.memory_space<smem>>
    %174 = vector.broadcast %173 : f32 to vector<1x352xf32>
    %175 = arith.mulf %174, %68 : vector<1x352xf32>
    %c61 = arith.constant 61 : index
    %176 = memref.load %arg1[%c61] : memref<98xf32, #tpu.memory_space<smem>>
    %177 = vector.broadcast %176 : f32 to vector<1x352xf32>
    %178 = arith.mulf %177, %72 : vector<1x352xf32>
    %c62 = arith.constant 62 : index
    %179 = memref.load %arg1[%c62] : memref<98xf32, #tpu.memory_space<smem>>
    %180 = vector.broadcast %179 : f32 to vector<1x352xf32>
    %181 = arith.mulf %180, %76 : vector<1x352xf32>
    %182 = arith.addf %163, %166 : vector<1x352xf32>
    %183 = arith.addf %169, %172 : vector<1x352xf32>
    %184 = arith.addf %175, %178 : vector<1x352xf32>
    %185 = arith.addf %182, %183 : vector<1x352xf32>
    %186 = arith.addf %184, %181 : vector<1x352xf32>
    %187 = arith.addf %185, %186 : vector<1x352xf32>
    %188 = arith.addf %160, %187 : vector<1x352xf32>
    %c0_94 = arith.constant 0 : index
    %c0_95 = arith.constant 0 : index
    %189 = vector.load %arg6[%c0_94, %c0_95] : memref<1x352xf32, #tpu.memory_space<vmem>>, vector<1x352xf32>
    tpu.vector_store %arg6[%c0_94, %c0_95], %188 {strides = array<i32>} : memref<1x352xf32, #tpu.memory_space<vmem>>, vector<1x352xf32>,
    %c0_96 = arith.constant 0 : index
    %c16 = arith.constant 16 : index
    %190 = vector.load %arg6[%c0_96, %c16] : memref<1x352xf32, #tpu.memory_space<vmem>>, vector<1x256xf32>
    %c14 = arith.constant 14 : index
    %191 = memref.load %arg1[%c14] : memref<98xf32, #tpu.memory_space<smem>>
    %192 = vector.broadcast %191 : f32 to vector<1x352xf32>
    %193 = arith.mulf %192, %28 : vector<1x352xf32>
    %c15 = arith.constant 15 : index
    %194 = memref.load %arg1[%c15] : memref<98xf32, #tpu.memory_space<smem>>
    %195 = vector.broadcast %194 : f32 to vector<1x352xf32>
    %196 = arith.mulf %195, %32 : vector<1x352xf32>
    %c16_97 = arith.constant 16 : index
    %197 = memref.load %arg1[%c16_97] : memref<98xf32, #tpu.memory_space<smem>>
    %198 = vector.broadcast %197 : f32 to vector<1x352xf32>
    %199 = arith.mulf %198, %36 : vector<1x352xf32>
    %c17 = arith.constant 17 : index
    %200 = memref.load %arg1[%c17] : memref<98xf32, #tpu.memory_space<smem>>
    %201 = vector.broadcast %200 : f32 to vector<1x352xf32>
    %202 = arith.mulf %201, %38 : vector<1x352xf32>
    %c18 = arith.constant 18 : index
    %203 = memref.load %arg1[%c18] : memref<98xf32, #tpu.memory_space<smem>>
    %204 = vector.broadcast %203 : f32 to vector<1x352xf32>
    %205 = arith.mulf %204, %42 : vector<1x352xf32>
    %c19 = arith.constant 19 : index
    %206 = memref.load %arg1[%c19] : memref<98xf32, #tpu.memory_space<smem>>
    %207 = vector.broadcast %206 : f32 to vector<1x352xf32>
    %208 = arith.mulf %207, %46 : vector<1x352xf32>
    %c20 = arith.constant 20 : index
    %209 = memref.load %arg1[%c20] : memref<98xf32, #tpu.memory_space<smem>>
    %210 = vector.broadcast %209 : f32 to vector<1x352xf32>
    %211 = arith.mulf %210, %50 : vector<1x352xf32>
    %212 = arith.addf %193, %196 : vector<1x352xf32>
    %213 = arith.addf %199, %202 : vector<1x352xf32>
    %214 = arith.addf %205, %208 : vector<1x352xf32>
    %215 = arith.addf %212, %213 : vector<1x352xf32>
    %216 = arith.addf %214, %211 : vector<1x352xf32>
    %217 = arith.addf %215, %216 : vector<1x352xf32>
    %c63 = arith.constant 63 : index
    %218 = memref.load %arg1[%c63] : memref<98xf32, #tpu.memory_space<smem>>
    %219 = vector.broadcast %218 : f32 to vector<1x352xf32>
    %220 = arith.mulf %219, %54 : vector<1x352xf32>
    %c64 = arith.constant 64 : index
    %221 = memref.load %arg1[%c64] : memref<98xf32, #tpu.memory_space<smem>>
    %222 = vector.broadcast %221 : f32 to vector<1x352xf32>
    %223 = arith.mulf %222, %58 : vector<1x352xf32>
    %c65 = arith.constant 65 : index
    %224 = memref.load %arg1[%c65] : memref<98xf32, #tpu.memory_space<smem>>
    %225 = vector.broadcast %224 : f32 to vector<1x352xf32>
    %226 = arith.mulf %225, %62 : vector<1x352xf32>
    %c66 = arith.constant 66 : index
    %227 = memref.load %arg1[%c66] : memref<98xf32, #tpu.memory_space<smem>>
    %228 = vector.broadcast %227 : f32 to vector<1x352xf32>
    %229 = arith.mulf %228, %64 : vector<1x352xf32>
    %c67 = arith.constant 67 : index
    %230 = memref.load %arg1[%c67] : memref<98xf32, #tpu.memory_space<smem>>
    %231 = vector.broadcast %230 : f32 to vector<1x352xf32>
    %232 = arith.mulf %231, %68 : vector<1x352xf32>
    %c68 = arith.constant 68 : index
    %233 = memref.load %arg1[%c68] : memref<98xf32, #tpu.memory_space<smem>>
    %234 = vector.broadcast %233 : f32 to vector<1x352xf32>
    %235 = arith.mulf %234, %72 : vector<1x352xf32>
    %c69 = arith.constant 69 : index
    %236 = memref.load %arg1[%c69] : memref<98xf32, #tpu.memory_space<smem>>
    %237 = vector.broadcast %236 : f32 to vector<1x352xf32>
    %238 = arith.mulf %237, %76 : vector<1x352xf32>
    %239 = arith.addf %220, %223 : vector<1x352xf32>
    %240 = arith.addf %226, %229 : vector<1x352xf32>
    %241 = arith.addf %232, %235 : vector<1x352xf32>
    %242 = arith.addf %239, %240 : vector<1x352xf32>
    %243 = arith.addf %241, %238 : vector<1x352xf32>
    %244 = arith.addf %242, %243 : vector<1x352xf32>
    %245 = arith.addf %217, %244 : vector<1x352xf32>
    %c0_98 = arith.constant 0 : index
    %c0_99 = arith.constant 0 : index
    %246 = vector.load %arg6[%c0_98, %c0_99] : memref<1x352xf32, #tpu.memory_space<vmem>>, vector<1x352xf32>
    tpu.vector_store %arg6[%c0_98, %c0_99], %245 {strides = array<i32>} : memref<1x352xf32, #tpu.memory_space<vmem>>, vector<1x352xf32>,
    %c0_100 = arith.constant 0 : index
    %c32 = arith.constant 32 : index
    %247 = vector.load %arg6[%c0_100, %c32] : memref<1x352xf32, #tpu.memory_space<vmem>>, vector<1x256xf32>
    %c21 = arith.constant 21 : index
    %248 = memref.load %arg1[%c21] : memref<98xf32, #tpu.memory_space<smem>>
    %249 = vector.broadcast %248 : f32 to vector<1x352xf32>
    %250 = arith.mulf %249, %28 : vector<1x352xf32>
    %c22 = arith.constant 22 : index
    %251 = memref.load %arg1[%c22] : memref<98xf32, #tpu.memory_space<smem>>
    %252 = vector.broadcast %251 : f32 to vector<1x352xf32>
    %253 = arith.mulf %252, %32 : vector<1x352xf32>
    %c23 = arith.constant 23 : index
    %254 = memref.load %arg1[%c23] : memref<98xf32, #tpu.memory_space<smem>>
    %255 = vector.broadcast %254 : f32 to vector<1x352xf32>
    %256 = arith.mulf %255, %36 : vector<1x352xf32>
    %c24 = arith.constant 24 : index
    %257 = memref.load %arg1[%c24] : memref<98xf32, #tpu.memory_space<smem>>
    %258 = vector.broadcast %257 : f32 to vector<1x352xf32>
    %259 = arith.mulf %258, %38 : vector<1x352xf32>
    %c25 = arith.constant 25 : index
    %260 = memref.load %arg1[%c25] : memref<98xf32, #tpu.memory_space<smem>>
    %261 = vector.broadcast %260 : f32 to vector<1x352xf32>
    %262 = arith.mulf %261, %42 : vector<1x352xf32>
    %c26 = arith.constant 26 : index
    %263 = memref.load %arg1[%c26] : memref<98xf32, #tpu.memory_space<smem>>
    %264 = vector.broadcast %263 : f32 to vector<1x352xf32>
    %265 = arith.mulf %264, %46 : vector<1x352xf32>
    %c27 = arith.constant 27 : index
    %266 = memref.load %arg1[%c27] : memref<98xf32, #tpu.memory_space<smem>>
    %267 = vector.broadcast %266 : f32 to vector<1x352xf32>
    %268 = arith.mulf %267, %50 : vector<1x352xf32>
    %269 = arith.addf %250, %253 : vector<1x352xf32>
    %270 = arith.addf %256, %259 : vector<1x352xf32>
    %271 = arith.addf %262, %265 : vector<1x352xf32>
    %272 = arith.addf %269, %270 : vector<1x352xf32>
    %273 = arith.addf %271, %268 : vector<1x352xf32>
    %274 = arith.addf %272, %273 : vector<1x352xf32>
    %c70 = arith.constant 70 : index
    %275 = memref.load %arg1[%c70] : memref<98xf32, #tpu.memory_space<smem>>
    %276 = vector.broadcast %275 : f32 to vector<1x352xf32>
    %277 = arith.mulf %276, %54 : vector<1x352xf32>
    %c71 = arith.constant 71 : index
    %278 = memref.load %arg1[%c71] : memref<98xf32, #tpu.memory_space<smem>>
    %279 = vector.broadcast %278 : f32 to vector<1x352xf32>
    %280 = arith.mulf %279, %58 : vector<1x352xf32>
    %c72 = arith.constant 72 : index
    %281 = memref.load %arg1[%c72] : memref<98xf32, #tpu.memory_space<smem>>
    %282 = vector.broadcast %281 : f32 to vector<1x352xf32>
    %283 = arith.mulf %282, %62 : vector<1x352xf32>
    %c73 = arith.constant 73 : index
    %284 = memref.load %arg1[%c73] : memref<98xf32, #tpu.memory_space<smem>>
    %285 = vector.broadcast %284 : f32 to vector<1x352xf32>
    %286 = arith.mulf %285, %64 : vector<1x352xf32>
    %c74 = arith.constant 74 : index
    %287 = memref.load %arg1[%c74] : memref<98xf32, #tpu.memory_space<smem>>
    %288 = vector.broadcast %287 : f32 to vector<1x352xf32>
    %289 = arith.mulf %288, %68 : vector<1x352xf32>
    %c75 = arith.constant 75 : index
    %290 = memref.load %arg1[%c75] : memref<98xf32, #tpu.memory_space<smem>>
    %291 = vector.broadcast %290 : f32 to vector<1x352xf32>
    %292 = arith.mulf %291, %72 : vector<1x352xf32>
    %c76 = arith.constant 76 : index
    %293 = memref.load %arg1[%c76] : memref<98xf32, #tpu.memory_space<smem>>
    %294 = vector.broadcast %293 : f32 to vector<1x352xf32>
    %295 = arith.mulf %294, %76 : vector<1x352xf32>
    %296 = arith.addf %277, %280 : vector<1x352xf32>
    %297 = arith.addf %283, %286 : vector<1x352xf32>
    %298 = arith.addf %289, %292 : vector<1x352xf32>
    %299 = arith.addf %296, %297 : vector<1x352xf32>
    %300 = arith.addf %298, %295 : vector<1x352xf32>
    %301 = arith.addf %299, %300 : vector<1x352xf32>
    %302 = arith.addf %274, %301 : vector<1x352xf32>
    %c0_101 = arith.constant 0 : index
    %c0_102 = arith.constant 0 : index
    %303 = vector.load %arg6[%c0_101, %c0_102] : memref<1x352xf32, #tpu.memory_space<vmem>>, vector<1x352xf32>
    tpu.vector_store %arg6[%c0_101, %c0_102], %302 {strides = array<i32>} : memref<1x352xf32, #tpu.memory_space<vmem>>, vector<1x352xf32>,
    %c0_103 = arith.constant 0 : index
    %c48 = arith.constant 48 : index
    %304 = vector.load %arg6[%c0_103, %c48] : memref<1x352xf32, #tpu.memory_space<vmem>>, vector<1x256xf32>
    %c28 = arith.constant 28 : index
    %305 = memref.load %arg1[%c28] : memref<98xf32, #tpu.memory_space<smem>>
    %306 = vector.broadcast %305 : f32 to vector<1x352xf32>
    %307 = arith.mulf %306, %28 : vector<1x352xf32>
    %c29 = arith.constant 29 : index
    %308 = memref.load %arg1[%c29] : memref<98xf32, #tpu.memory_space<smem>>
    %309 = vector.broadcast %308 : f32 to vector<1x352xf32>
    %310 = arith.mulf %309, %32 : vector<1x352xf32>
    %c30 = arith.constant 30 : index
    %311 = memref.load %arg1[%c30] : memref<98xf32, #tpu.memory_space<smem>>
    %312 = vector.broadcast %311 : f32 to vector<1x352xf32>
    %313 = arith.mulf %312, %36 : vector<1x352xf32>
    %c31 = arith.constant 31 : index
    %314 = memref.load %arg1[%c31] : memref<98xf32, #tpu.memory_space<smem>>
    %315 = vector.broadcast %314 : f32 to vector<1x352xf32>
    %316 = arith.mulf %315, %38 : vector<1x352xf32>
    %c32_104 = arith.constant 32 : index
    %317 = memref.load %arg1[%c32_104] : memref<98xf32, #tpu.memory_space<smem>>
    %318 = vector.broadcast %317 : f32 to vector<1x352xf32>
    %319 = arith.mulf %318, %42 : vector<1x352xf32>
    %c33 = arith.constant 33 : index
    %320 = memref.load %arg1[%c33] : memref<98xf32, #tpu.memory_space<smem>>
    %321 = vector.broadcast %320 : f32 to vector<1x352xf32>
    %322 = arith.mulf %321, %46 : vector<1x352xf32>
    %c34 = arith.constant 34 : index
    %323 = memref.load %arg1[%c34] : memref<98xf32, #tpu.memory_space<smem>>
    %324 = vector.broadcast %323 : f32 to vector<1x352xf32>
    %325 = arith.mulf %324, %50 : vector<1x352xf32>
    %326 = arith.addf %307, %310 : vector<1x352xf32>
    %327 = arith.addf %313, %316 : vector<1x352xf32>
    %328 = arith.addf %319, %322 : vector<1x352xf32>
    %329 = arith.addf %326, %327 : vector<1x352xf32>
    %330 = arith.addf %328, %325 : vector<1x352xf32>
    %331 = arith.addf %329, %330 : vector<1x352xf32>
    %c77 = arith.constant 77 : index
    %332 = memref.load %arg1[%c77] : memref<98xf32, #tpu.memory_space<smem>>
    %333 = vector.broadcast %332 : f32 to vector<1x352xf32>
    %334 = arith.mulf %333, %54 : vector<1x352xf32>
    %c78 = arith.constant 78 : index
    %335 = memref.load %arg1[%c78] : memref<98xf32, #tpu.memory_space<smem>>
    %336 = vector.broadcast %335 : f32 to vector<1x352xf32>
    %337 = arith.mulf %336, %58 : vector<1x352xf32>
    %c79 = arith.constant 79 : index
    %338 = memref.load %arg1[%c79] : memref<98xf32, #tpu.memory_space<smem>>
    %339 = vector.broadcast %338 : f32 to vector<1x352xf32>
    %340 = arith.mulf %339, %62 : vector<1x352xf32>
    %c80 = arith.constant 80 : index
    %341 = memref.load %arg1[%c80] : memref<98xf32, #tpu.memory_space<smem>>
    %342 = vector.broadcast %341 : f32 to vector<1x352xf32>
    %343 = arith.mulf %342, %64 : vector<1x352xf32>
    %c81 = arith.constant 81 : index
    %344 = memref.load %arg1[%c81] : memref<98xf32, #tpu.memory_space<smem>>
    %345 = vector.broadcast %344 : f32 to vector<1x352xf32>
    %346 = arith.mulf %345, %68 : vector<1x352xf32>
    %c82 = arith.constant 82 : index
    %347 = memref.load %arg1[%c82] : memref<98xf32, #tpu.memory_space<smem>>
    %348 = vector.broadcast %347 : f32 to vector<1x352xf32>
    %349 = arith.mulf %348, %72 : vector<1x352xf32>
    %c83 = arith.constant 83 : index
    %350 = memref.load %arg1[%c83] : memref<98xf32, #tpu.memory_space<smem>>
    %351 = vector.broadcast %350 : f32 to vector<1x352xf32>
    %352 = arith.mulf %351, %76 : vector<1x352xf32>
    %353 = arith.addf %334, %337 : vector<1x352xf32>
    %354 = arith.addf %340, %343 : vector<1x352xf32>
    %355 = arith.addf %346, %349 : vector<1x352xf32>
    %356 = arith.addf %353, %354 : vector<1x352xf32>
    %357 = arith.addf %355, %352 : vector<1x352xf32>
    %358 = arith.addf %356, %357 : vector<1x352xf32>
    %359 = arith.addf %331, %358 : vector<1x352xf32>
    %c0_105 = arith.constant 0 : index
    %c0_106 = arith.constant 0 : index
    %360 = vector.load %arg6[%c0_105, %c0_106] : memref<1x352xf32, #tpu.memory_space<vmem>>, vector<1x352xf32>
    tpu.vector_store %arg6[%c0_105, %c0_106], %359 {strides = array<i32>} : memref<1x352xf32, #tpu.memory_space<vmem>>, vector<1x352xf32>,
    %c0_107 = arith.constant 0 : index
    %c64_108 = arith.constant 64 : index
    %361 = vector.load %arg6[%c0_107, %c64_108] : memref<1x352xf32, #tpu.memory_space<vmem>>, vector<1x256xf32>
    %c35 = arith.constant 35 : index
    %362 = memref.load %arg1[%c35] : memref<98xf32, #tpu.memory_space<smem>>
    %363 = vector.broadcast %362 : f32 to vector<1x352xf32>
    %364 = arith.mulf %363, %28 : vector<1x352xf32>
    %c36 = arith.constant 36 : index
    %365 = memref.load %arg1[%c36] : memref<98xf32, #tpu.memory_space<smem>>
    %366 = vector.broadcast %365 : f32 to vector<1x352xf32>
    %367 = arith.mulf %366, %32 : vector<1x352xf32>
    %c37 = arith.constant 37 : index
    %368 = memref.load %arg1[%c37] : memref<98xf32, #tpu.memory_space<smem>>
    %369 = vector.broadcast %368 : f32 to vector<1x352xf32>
    %370 = arith.mulf %369, %36 : vector<1x352xf32>
    %c38 = arith.constant 38 : index
    %371 = memref.load %arg1[%c38] : memref<98xf32, #tpu.memory_space<smem>>
    %372 = vector.broadcast %371 : f32 to vector<1x352xf32>
    %373 = arith.mulf %372, %38 : vector<1x352xf32>
    %c39 = arith.constant 39 : index
    %374 = memref.load %arg1[%c39] : memref<98xf32, #tpu.memory_space<smem>>
    %375 = vector.broadcast %374 : f32 to vector<1x352xf32>
    %376 = arith.mulf %375, %42 : vector<1x352xf32>
    %c40 = arith.constant 40 : index
    %377 = memref.load %arg1[%c40] : memref<98xf32, #tpu.memory_space<smem>>
    %378 = vector.broadcast %377 : f32 to vector<1x352xf32>
    %379 = arith.mulf %378, %46 : vector<1x352xf32>
    %c41 = arith.constant 41 : index
    %380 = memref.load %arg1[%c41] : memref<98xf32, #tpu.memory_space<smem>>
    %381 = vector.broadcast %380 : f32 to vector<1x352xf32>
    %382 = arith.mulf %381, %50 : vector<1x352xf32>
    %383 = arith.addf %364, %367 : vector<1x352xf32>
    %384 = arith.addf %370, %373 : vector<1x352xf32>
    %385 = arith.addf %376, %379 : vector<1x352xf32>
    %386 = arith.addf %383, %384 : vector<1x352xf32>
    %387 = arith.addf %385, %382 : vector<1x352xf32>
    %388 = arith.addf %386, %387 : vector<1x352xf32>
    %c84 = arith.constant 84 : index
    %389 = memref.load %arg1[%c84] : memref<98xf32, #tpu.memory_space<smem>>
    %390 = vector.broadcast %389 : f32 to vector<1x352xf32>
    %391 = arith.mulf %390, %54 : vector<1x352xf32>
    %c85 = arith.constant 85 : index
    %392 = memref.load %arg1[%c85] : memref<98xf32, #tpu.memory_space<smem>>
    %393 = vector.broadcast %392 : f32 to vector<1x352xf32>
    %394 = arith.mulf %393, %58 : vector<1x352xf32>
    %c86 = arith.constant 86 : index
    %395 = memref.load %arg1[%c86] : memref<98xf32, #tpu.memory_space<smem>>
    %396 = vector.broadcast %395 : f32 to vector<1x352xf32>
    %397 = arith.mulf %396, %62 : vector<1x352xf32>
    %c87 = arith.constant 87 : index
    %398 = memref.load %arg1[%c87] : memref<98xf32, #tpu.memory_space<smem>>
    %399 = vector.broadcast %398 : f32 to vector<1x352xf32>
    %400 = arith.mulf %399, %64 : vector<1x352xf32>
    %c88 = arith.constant 88 : index
    %401 = memref.load %arg1[%c88] : memref<98xf32, #tpu.memory_space<smem>>
    %402 = vector.broadcast %401 : f32 to vector<1x352xf32>
    %403 = arith.mulf %402, %68 : vector<1x352xf32>
    %c89 = arith.constant 89 : index
    %404 = memref.load %arg1[%c89] : memref<98xf32, #tpu.memory_space<smem>>
    %405 = vector.broadcast %404 : f32 to vector<1x352xf32>
    %406 = arith.mulf %405, %72 : vector<1x352xf32>
    %c90 = arith.constant 90 : index
    %407 = memref.load %arg1[%c90] : memref<98xf32, #tpu.memory_space<smem>>
    %408 = vector.broadcast %407 : f32 to vector<1x352xf32>
    %409 = arith.mulf %408, %76 : vector<1x352xf32>
    %410 = arith.addf %391, %394 : vector<1x352xf32>
    %411 = arith.addf %397, %400 : vector<1x352xf32>
    %412 = arith.addf %403, %406 : vector<1x352xf32>
    %413 = arith.addf %410, %411 : vector<1x352xf32>
    %414 = arith.addf %412, %409 : vector<1x352xf32>
    %415 = arith.addf %413, %414 : vector<1x352xf32>
    %416 = arith.addf %388, %415 : vector<1x352xf32>
    %c0_109 = arith.constant 0 : index
    %c0_110 = arith.constant 0 : index
    %417 = vector.load %arg6[%c0_109, %c0_110] : memref<1x352xf32, #tpu.memory_space<vmem>>, vector<1x352xf32>
    tpu.vector_store %arg6[%c0_109, %c0_110], %416 {strides = array<i32>} : memref<1x352xf32, #tpu.memory_space<vmem>>, vector<1x352xf32>,
    %c0_111 = arith.constant 0 : index
    %c80_112 = arith.constant 80 : index
    %418 = vector.load %arg6[%c0_111, %c80_112] : memref<1x352xf32, #tpu.memory_space<vmem>>, vector<1x256xf32>
    %c42 = arith.constant 42 : index
    %419 = memref.load %arg1[%c42] : memref<98xf32, #tpu.memory_space<smem>>
    %420 = vector.broadcast %419 : f32 to vector<1x352xf32>
    %421 = arith.mulf %420, %28 : vector<1x352xf32>
    %c43 = arith.constant 43 : index
    %422 = memref.load %arg1[%c43] : memref<98xf32, #tpu.memory_space<smem>>
    %423 = vector.broadcast %422 : f32 to vector<1x352xf32>
    %424 = arith.mulf %423, %32 : vector<1x352xf32>
    %c44 = arith.constant 44 : index
    %425 = memref.load %arg1[%c44] : memref<98xf32, #tpu.memory_space<smem>>
    %426 = vector.broadcast %425 : f32 to vector<1x352xf32>
    %427 = arith.mulf %426, %36 : vector<1x352xf32>
    %c45 = arith.constant 45 : index
    %428 = memref.load %arg1[%c45] : memref<98xf32, #tpu.memory_space<smem>>
    %429 = vector.broadcast %428 : f32 to vector<1x352xf32>
    %430 = arith.mulf %429, %38 : vector<1x352xf32>
    %c46 = arith.constant 46 : index
    %431 = memref.load %arg1[%c46] : memref<98xf32, #tpu.memory_space<smem>>
    %432 = vector.broadcast %431 : f32 to vector<1x352xf32>
    %433 = arith.mulf %432, %42 : vector<1x352xf32>
    %c47 = arith.constant 47 : index
    %434 = memref.load %arg1[%c47] : memref<98xf32, #tpu.memory_space<smem>>
    %435 = vector.broadcast %434 : f32 to vector<1x352xf32>
    %436 = arith.mulf %435, %46 : vector<1x352xf32>
    %c48_113 = arith.constant 48 : index
    %437 = memref.load %arg1[%c48_113] : memref<98xf32, #tpu.memory_space<smem>>
    %438 = vector.broadcast %437 : f32 to vector<1x352xf32>
    %439 = arith.mulf %438, %50 : vector<1x352xf32>
    %440 = arith.addf %421, %424 : vector<1x352xf32>
    %441 = arith.addf %427, %430 : vector<1x352xf32>
    %442 = arith.addf %433, %436 : vector<1x352xf32>
    %443 = arith.addf %440, %441 : vector<1x352xf32>
    %444 = arith.addf %442, %439 : vector<1x352xf32>
    %445 = arith.addf %443, %444 : vector<1x352xf32>
    %c91 = arith.constant 91 : index
    %446 = memref.load %arg1[%c91] : memref<98xf32, #tpu.memory_space<smem>>
    %447 = vector.broadcast %446 : f32 to vector<1x352xf32>
    %448 = arith.mulf %447, %54 : vector<1x352xf32>
    %c92 = arith.constant 92 : index
    %449 = memref.load %arg1[%c92] : memref<98xf32, #tpu.memory_space<smem>>
    %450 = vector.broadcast %449 : f32 to vector<1x352xf32>
    %451 = arith.mulf %450, %58 : vector<1x352xf32>
    %c93 = arith.constant 93 : index
    %452 = memref.load %arg1[%c93] : memref<98xf32, #tpu.memory_space<smem>>
    %453 = vector.broadcast %452 : f32 to vector<1x352xf32>
    %454 = arith.mulf %453, %62 : vector<1x352xf32>
    %c94 = arith.constant 94 : index
    %455 = memref.load %arg1[%c94] : memref<98xf32, #tpu.memory_space<smem>>
    %456 = vector.broadcast %455 : f32 to vector<1x352xf32>
    %457 = arith.mulf %456, %64 : vector<1x352xf32>
    %c95 = arith.constant 95 : index
    %458 = memref.load %arg1[%c95] : memref<98xf32, #tpu.memory_space<smem>>
    %459 = vector.broadcast %458 : f32 to vector<1x352xf32>
    %460 = arith.mulf %459, %68 : vector<1x352xf32>
    %c96 = arith.constant 96 : index
    %461 = memref.load %arg1[%c96] : memref<98xf32, #tpu.memory_space<smem>>
    %462 = vector.broadcast %461 : f32 to vector<1x352xf32>
    %463 = arith.mulf %462, %72 : vector<1x352xf32>
    %c97 = arith.constant 97 : index
    %464 = memref.load %arg1[%c97] : memref<98xf32, #tpu.memory_space<smem>>
    %465 = vector.broadcast %464 : f32 to vector<1x352xf32>
    %466 = arith.mulf %465, %76 : vector<1x352xf32>
    %467 = arith.addf %448, %451 : vector<1x352xf32>
    %468 = arith.addf %454, %457 : vector<1x352xf32>
    %469 = arith.addf %460, %463 : vector<1x352xf32>
    %470 = arith.addf %467, %468 : vector<1x352xf32>
    %471 = arith.addf %469, %466 : vector<1x352xf32>
    %472 = arith.addf %470, %471 : vector<1x352xf32>
    %473 = arith.addf %445, %472 : vector<1x352xf32>
    %c0_114 = arith.constant 0 : index
    %c0_115 = arith.constant 0 : index
    %474 = vector.load %arg6[%c0_114, %c0_115] : memref<1x352xf32, #tpu.memory_space<vmem>>, vector<1x352xf32>
    tpu.vector_store %arg6[%c0_114, %c0_115], %473 {strides = array<i32>} : memref<1x352xf32, #tpu.memory_space<vmem>>, vector<1x352xf32>,
    %c0_116 = arith.constant 0 : index
    %c96_117 = arith.constant 96 : index
    %475 = vector.load %arg6[%c0_116, %c96_117] : memref<1x352xf32, #tpu.memory_space<vmem>>, vector<1x256xf32>
    %476 = arith.addf %133, %190 : vector<1x256xf32>
    %477 = arith.addf %247, %304 : vector<1x256xf32>
    %478 = arith.addf %361, %418 : vector<1x256xf32>
    %479 = arith.addf %476, %477 : vector<1x256xf32>
    %480 = arith.addf %478, %475 : vector<1x256xf32>
    %481 = arith.addf %479, %480 : vector<1x256xf32>
    %482 = arith.negf %481 : vector<1x256xf32>
    %483 = math.exp %482 : vector<1x256xf32>
    %cst_118 = arith.constant 1.000000e+00 : f32
    %484 = vector.broadcast %cst_118 : f32 to vector<1x256xf32>
    %485 = arith.addf %484, %483 : vector<1x256xf32>
    %486 = arith.divf %484, %485 : vector<1x256xf32>
    %c0_119 = arith.constant 0 : index
    %c0_120 = arith.constant 0 : index
    %c0_121 = arith.constant 0 : index
    %487 = vector.load %arg4[%c0_119, %c0_120, %c0_121] : memref<1x1x256xf32, #tpu.memory_space<vmem>>, vector<1x1x256xf32>
    %488 = vector.shape_cast %487 : vector<1x1x256xf32> to vector<1x256xf32>
    %489 = vector.shape_cast %486 : vector<1x256xf32> to vector<1x1x256xf32>
    tpu.vector_store %arg4[%c0_119, %c0_120, %c0_121], %489 {strides = array<i32>} : memref<1x1x256xf32, #tpu.memory_space<vmem>>, vector<1x1x256xf32>,
    return
  }
  func.func @transform_0(%arg0: i32, %arg1: memref<98xf32, #tpu.memory_space<smem>>) -> (i32, i32) {
    %c0_i32 = arith.constant 0 : i32
    %c0_i32_0 = arith.constant 0 : i32
    %c0_i32_1 = arith.constant 0 : i32
    return %c0_i32, %c0_i32_0 : i32, i32
  }
  func.func @transform_1(%arg0: i32, %arg1: memref<98xf32, #tpu.memory_space<smem>>) -> (i32, i32, i32) {
    %c0_i32 = arith.constant 0 : i32
    %c0_i32_0 = arith.constant 0 : i32
    %c0_i32_1 = arith.constant 0 : i32
    return %arg0, %c0_i32, %c0_i32_0 : i32, i32, i32
  }
  func.func @transform_2(%arg0: i32, %arg1: memref<98xf32, #tpu.memory_space<smem>>) -> (i32, i32, i32) {
    %c0_i32 = arith.constant 0 : i32
    %c0_i32_0 = arith.constant 0 : i32
    %c0_i32_1 = arith.constant 0 : i32
    return %arg0, %c0_i32, %c0_i32_0 : i32, i32, i32
  }
}

</mosaic_0001>

<bundles_post_ra>
// kernel: spatial_attention.1
= control target key start
LH: loop header
LB: loop body
LE: loop exit
PB: predicated region body
PF: predicated region fallthrough
CT: control target
= control target key end

     0   :  { %s1447_s15 = smov [#allocation5]   ;;  %s2153_s0 = inlined_call_operand.vmem [shape: f32[98], index: 0, kind: input, shape index: {}]   ;;  %s2154_s1 = inlined_call_operand.vmem [shape: f32[7,352], index: 1, kind: input, shape index: {}]   ;;  %s2155_s2 = inlined_call_operand.vmem [shape: f32[2,4,256], index: 2, kind: input, shape index: {}]   ;;  %s2156_s3 = inlined_call_operand.vmem [shape: f32[2,1,256], index: 3, kind: output, shape index: {}]  }
   0x1   :  { %s9_s14 = sshll.u32 %s2153_s0, 4  ;;  %s10_s14 = int_to_ptr.vmem [resolvable:$true] %s9_s14 }
   0x2   :  { %12 = dma.vmem_to_smem %s10_s14, 16, %s1447_s15, [#allocation4] }
   0x3   :  { %1441 = dma.done.wait [#allocation4], 16 }
   0x4   :  { %1442 = vsyncadd [#allocation4], 4294967280 }
   0x5   :  { %15 = sfence }
   0x6   :  { %s1484_s16 = smov 0  }
   0x7 LB: > { %s1282_s17 = sadd.s32 4294967295, %s1445_s16   ;;  %p1286_p0 = scmp.ge.s32.totalorder %s1445_s16, 1  ;;  %s1445_s16 = sphi %s1484_s16, %s21_s16  }
   0x8   : > { %p121_p1 = scmp.lt.s32.totalorder %s1445_s16, 3 }
   0xa   : > { %p122_p2 = pnand %p1286_p0, %p121_p1 }
   0xb   : > { %p142_p3 = scmp.lt.s32.totalorder (!%p122_p2), %s1282_s17, 1  ;;  %s1448_s19 = smov (!%p122_p2), 5  }
   0xc   : > { %125 = sbr.rel (%p122_p2) target bundleno = 818 (0x332), region = 28  ;;  %s1449_s23 = smov (!%p122_p2), 1  }
   0xd   : > { %s1450_s29 = smov (!%p122_p2), 6   ;;  %s1451_s5 = smov (!%p122_p2), 2  }
   0xe   : > { %s1452_s6 = smov (!%p122_p2), 51   ;;  %s1453_s9 = smov (!%p122_p2), 4  }
   0xf   : > { %s1307_s10 = sld [smem:[#allocation5 + $0x34]] (!%p122_p2)  ;;  %s1455_s15 = smov (!%p122_p2), 127  }
  0x10   : > { %s1391_s11 = sld [smem:[#allocation5 + $0x5e]] (!%p122_p2) }
  0x11   : > { %v1296_v0 = vld [vmem:[%s2154_s1 + $0x5] ss:$8 sm:$0x7]  ;;  %s2164_s17 = smov (!%p142_p3, %s1282_s17), 1  ;;  %v165_v16 = vlaneseq  ;;  %v1454_v18 = vmov 0.0   ;;  %vm180_vm5 = vcmask 416768  }
  0x12   : > { %230 = vrot.lane.b32.xlu1 %v1296_v0, %s1448_s19  ;;  %v1293_v1 = vld [vmem:[%s2154_s1 + $0x1] ss:$8 sm:$0x7]  ;;  %s1398_s22 = sshll.u32 %s2164_s17, 3  ;;  %s1321_s12 = sld [smem:[#allocation5 + $0x3b]]  ;;  %vm203_vm7 = vcmask 7168  }
  0x13   : > { %200 = vrot.lane.b32.xlu2 %v1293_v1, %s1449_s23  ;;  %s146_s26 = scalar_lea.vmem %s2155_s2, %s1398_s22  ;;  %v1297_v2 = vld [vmem:[%s2154_s1 + $0x6] ss:$8 sm:$0x7]  ;;  %v1294_v11 = vld [vmem:[%s2154_s1 + $0x2] ss:$8 sm:$0x7] }
  0x14   : > { %v151_v3 = vld [vmem:[%s146_s26] ss:$4 sm:$0x3]  ;;  %v1290_v4 = vld [vmem:[%s146_s26 + $0x1] ss:$4 sm:$0x3] }
  0x15   : > { %v155_v5 = vmax.f32 %v151_v3, %v1290_v4  ;;  %v1291_v6 = vld [vmem:[%s146_s26 + $0x2] ss:$4 sm:$0x3]  ;;  %v154_v7 = vadd.f32 %v1290_v4, %v151_v3  ;;  %v1292_v8 = vld [vmem:[%s146_s26 + $0x3] ss:$4 sm:$0x3]  ;;  %v330_v27 = vstv %s1307_s10 }
  0x16   : > { %v1295_v15 = vld [vmem:[%s2154_s1 + $0x4] ss:$8 sm:$0x7]  ;;  %vm167_vm0 = vcmp.lt.s32.totalorder %v165_v16, 51  ;;  %vm1515_vm1 = vcmp.ge.s32.totalorder %v165_v16, 51  ;;  %vm172_vm2 = vcmp.lt.s32.totalorder %v165_v16, 102  ;;  %v1106_v28 = vstv %s1391_s11 }
  0x17   : > { %v159_v9 = vmax.f32 %v155_v5, %v1291_v6  ;;  %v158_v10 = vadd.f32 %v1291_v6, %v154_v7  ;;  %170 = vst.msk [vmem:[#allocation2 + $0x3] sm:$0x1] %vm167_vm0, %v1454_v18  ;;  %vm173_vm3 = vmand %vm1515_vm1, %vm172_vm2  ;;  %vm1523_vm4 = vcmp.lt.s32.totalorder %v165_v16, 307  ;;  %s1305_s13 = sld [smem:[#allocation5 + $0x32]]  ;;  %vm233_vm8 = vcmask 39936  }
  0x18   : > { %175 = vst.msk [vmem:[#allocation2 + $0x5] sm:$0x1] %vm173_vm3, %v1454_v18  ;;  %vm184_vm6 = vmand %vm1515_vm1, %vm1523_vm4  ;;  %s1300_s14 = sld [smem:[#allocation5 + $0x3]]  ;;  %v461_v36 = vstv %s1321_s12  ;;  %vm243_vm9 = vcmask 48128   ;;  %vm223_vm10 = vcmask 31744   ;;  %vm213_vm11 = vcmask 15360  }
  0x19   : > { %v163_v12 = vmax.f32 %v159_v9, %v1292_v8  ;;  %v162_v13 = vadd.f32 %v1292_v8, %v158_v10  ;;  %169 = vst.msk [vmem:[#allocation2] sm:$0x1] %vm167_vm0, %v1454_v18  ;;  %s1335_s0 = sld [smem:[#allocation5 + $0x42]]  ;;  %vm279_vm12 = vcmask 1039360   ;;  %vm301_vm13 = vcmask 1031168  }
  0x1a   : > { %240 = vrot.lane.b32.xlu1 %v1297_v2, %s1450_s29  ;;  %174 = vst.msk [vmem:[#allocation2 + $0x2] sm:$0x1] %vm173_vm3, %v1454_v18  ;;  %s1319_s18 = sld [smem:[#allocation5 + $0x39]]  ;;  %s1456_s29 = smov 126   ;;  %vm316_vm14 = vcmask 1014784   ;;  %vm2014_vm15 = vcmp.lt.s32.totalorder %v165_v16, 352 }
  0x1b   : > { %210 = vrot.lane.b32.xlu2 %v1294_v11, %s1451_s5  ;;  %187 = vrot.lane.b32.xlu0 %v163_v12, %s1452_s6  ;;  %v164_v14 = vmul.f32 0.25, %v162_v13  ;;  %s1309_s19 = sld [smem:[#allocation5 + $0x36]]  ;;  %vm1166_vm0 = vcmask 916480   ;;  %vm1188_vm1 = vcmask 785408   ;;  %vm1203_vm2 = vcmask 523264  }
  0x1c   : > { %s1302_s20 = sld [smem:[#allocation5 + $0x5]] }
  0x1d   : > { %v324_v37 = vstv %s1305_s13  ;;  %s1349_s21 = sld [smem:[#allocation5 + $0x49]] }
  0x1e   : > { %v264_v38 = vstv %s1300_s14  ;;  %s1314_s22 = sld [smem:[#allocation5 + $0xa]] }
  0x1f   : > { %v590_v45 = vstv %s1335_s0  ;;  %s1363_s23 = sld [smem:[#allocation5 + $0x50]] }
  0x20   : > { %v455_v46 = vstv %s1319_s18  ;;  %s1303_s24 = sld [smem:[#allocation5 + $0x6]] }
  0x21   : > { %v336_v48 = vstv %s1309_s19  ;;  %s1323_s25 = sld [smem:[#allocation5 + $0x3d]] }
  0x22   : > { %v270_v54 = vstv %s1302_s20  ;;  %s1377_s26 = sld [smem:[#allocation5 + $0x57]] }
  0x23   : > { %177 = vrot.lane.b32.xlu0 %v164_v14, %s1452_s6  ;;  %v719_v56 = vstv %s1349_s21  ;;  %s1316_s27 = sld [smem:[#allocation5 + $0xc]] }
  0x24   : > { %v398_v57 = vstv %s1314_s22  ;;  %s1328_s28 = sld [smem:[#allocation5 + $0x11]] }
  0x25   : > { %v848_v0 = vstv %s1363_s23  ;;  %s1310_s30 = sld [smem:[#allocation5 + $0x37]] }
  0x26   : > { %v273_v1 = vstv %s1303_s24  ;;  %s1317_s4 = sld [smem:[#allocation5 + $0xd]] }
  0x27   : > { %v467_v2 = vstv %s1323_s25  ;;  %s1337_s5 = sld [smem:[#allocation5 + $0x44]] }
  0x28   : > { %v977_v6 = vstv %s1377_s26  ;;  %s1324_s6 = sld [smem:[#allocation5 + $0x3e]] }
  0x29   : > { %v404_v7 = vstv %s1316_s27  ;;  %s1330_s7 = sld [smem:[#allocation5 + $0x13]] }
  0x2a   : > { %v527_v8 = vstv %s1328_s28  ;;  %s1342_s8 = sld [smem:[#allocation5 + $0x18]] }
  0x2b   : > { %220 = vrot.lane.b32.xlu0 %v1295_v15, %s1453_s9  ;;  %v339_v13 = vstv %s1310_s30  ;;  %s1338_s9 = sld [smem:[#allocation5 + $0x45]] }
  0x2c   : > { %v407_v14 = vstv %s1317_s4  ;;  %s1331_s10 = sld [smem:[#allocation5 + $0x14]] }
  0x2d   : > { %v596_v15 = vstv %s1337_s5  ;;  %s1351_s11 = sld [smem:[#allocation5 + $0x4b]] }
  0x2e   : > { %s1352_s12 = sld [smem:[#allocation5 + $0x4c]] }
  0x2f   : > { %s1344_s13 = sld [smem:[#allocation5 + $0x1a]] }
  0x30   : > { %s1356_s14 = sld [smem:[#allocation5 + $0x1f]] }
  0x31   : > { %s1366_s0 = sld [smem:[#allocation5 + $0x53]] }
  0x32   : > { %s1345_s18 = sld [smem:[#allocation5 + $0x1b]] }
  0x33   : > { %s1365_s19 = sld [smem:[#allocation5 + $0x52]] }
  0x34   : > { %s1384_s20 = sld [smem:[#allocation5 + $0x2d]] }
  0x35   : > { %s1358_s21 = sld [smem:[#allocation5 + $0x21]] }
  0x36   : > { %s1370_s22 = sld [smem:[#allocation5 + $0x26]] }
  0x37   : > { %s1393_s23 = sld [smem:[#allocation5 + $0x60]] }
  0x38   : > { %s1359_s24 = sld [smem:[#allocation5 + $0x22]] }
  0x39   : > { %s1379_s25 = sld [smem:[#allocation5 + $0x59]] }
  0x3a   : > { %s1372_s26 = sld [smem:[#allocation5 + $0x28]] }
  0x3b   : > { %s1298_s27 = sld [smem:[#allocation5 + $0x1]] }
  0x3c   : > { %s1380_s28 = sld [smem:[#allocation5 + $0x5a]] }
  0x3d   : > { %s1641_s30 = sld [smem:[#allocation5 + $0x2]] }
  0x3e   : > { %s1643_s4 = sld [smem:[#allocation5 + $0x35]] }
  0x3f   : > { %s1645_s5 = sld [smem:[#allocation5 + $0x29]] }
  0x6d   : > { %v201_v23 = vpop.permute.xlu2 %200 }
  0x6e   : > { %v202_v25 = vrot.slane %v201_v23, 7 }
  0x70   : > { %v204_v33 = vsel %vm203_vm7, %v202_v25, %v201_v23 }
  0x84   : > { %v231_v35 = vpop.permute.xlu1 %230 }
  0x85   : > { %v232_v39 = vrot.slane %v231_v35, 7 }
  0x87   : > { %v234_v44 = vsel %vm233_vm8, %v232_v39, %v231_v35  ;;  %v662_v35 = vstv %s1344_s13  ;;  %s1696_s13 = sld [smem:[#allocation5 + $0xf]] }
  0x8c   : > { %v241_v55 = vpop.permute.xlu1 %240 }
  0x8d   : > { %v188_v20 = vpop.permute.xlu0 %187  ;;  %v242_v59 = vrot.slane %v241_v55, 7 }
  0x8e   : > { %v189_v21 = vrot.slane %v188_v20, 7 }
  0x8f   : > { %v244_v62 = vsel %vm243_vm9, %v242_v59, %v241_v55  ;;  %v983_v59 = vstv %s1379_s25  ;;  %s1347_s25 = sld [smem:[#allocation5 + $0x47]] }
  0x90   : > { %v190_v22 = vsel %vm180_vm5, %v189_v21, %v188_v20  ;;  %v470_v20 = vstv %s1324_s6  ;;  %v533_v21 = vstv %s1330_s7  ;;  %s1394_s6 = sld [smem:[#allocation5 + $0x61]] }
  0x91   : > { %193 = vst.msk [vmem:[#allocation2 + $0x3] sm:$0x7] %vm184_vm6, %v190_v22  ;;  %v656_v22 = vstv %s1342_s8  ;;  %s1663_s7 = sld [smem:[#allocation5 + $0x5d]] }
  0x92   : > { %s1666_s8 = sld [smem:[#allocation5 + $0x9]] }
  0x95   : > { %v178_v24 = vpop.permute.xlu0 %177 }
  0x96   : > { %v179_v26 = vrot.slane %v178_v24, 7 }
  0x98   : > { %v1537_v29 = vld [vmem:[#allocation2 + $0x3] sm:$0x7]  ;;  %v181_v30 = vsel %vm180_vm5, %v179_v26, %v178_v24  ;;  %v599_v26 = vstv %s1338_s9  ;;  %s1670_s9 = sld [smem:[#allocation5 + $0x30]]  ;;  %vm1226_vm5 = vcmp.lt.s32.totalorder %v165_v16, 256 }
  0x99   : > { %185 = vst.msk [vmem:[#allocation2] sm:$0x7] %vm184_vm6, %v181_v30  ;;  %v331_v31 = vmul.f32 %v330_v27, %v1537_v29  ;;  %v1107_v32 = vmul.f32 %v1106_v28, %v1537_v29  ;;  %v1550_v34 = vmul.f32 %v1537_v29, %v204_v33  ;;  %v462_v41 = vmul.f32 %v461_v36, %v1537_v29 }
  0x9a   : > { %v1561_v47 = vmul.f32 %v1537_v29, %v234_v44  ;;  %v591_v50 = vmul.f32 %v590_v45, %v1537_v29  ;;  %v720_v60 = vmul.f32 %v719_v56, %v1537_v29  ;;  %v849_v3 = vmul.f32 %v848_v0, %v1537_v29  ;;  %v211_v56 = vpop.permute.xlu2 %210 }
  0x9b   : > { %349 = vrot.lane.b32.xlu1 %v331_v31, %s1455_s15  ;;  %1125 = vrot.lane.b32.xlu0 %v1107_v32, %s1455_s15  ;;  %v325_v42 = vmul.f32 %v324_v37, %v1550_v34  ;;  %v456_v51 = vmul.f32 %v455_v46, %v1550_v34  ;;  %v978_v9 = vmul.f32 %v977_v6, %v1537_v29  ;;  %v536_v27 = vstv %s1331_s10  ;;  %s1673_s10 = sld [smem:[#allocation5 + $0x40]] }
  0x9c   : > { %v337_v52 = vmul.f32 %v336_v48, %v1561_v47  ;;  %v468_v5 = vmul.f32 %v467_v2, %v1561_v47  ;;  %v1597_v12 = vmul.f32 %v1537_v29, %v244_v62  ;;  %v597_v19 = vmul.f32 %v596_v15, %v1561_v47 }
  0x9d   : > { %v725_v28 = vstv %s1351_s11  ;;  %v785_v36 = vstv %s1356_s14  ;;  %v1043_v48 = vstv %s1384_s20  ;;  %v984_v0 = vmul.f32 %v983_v59, %v1561_v47  ;;  %s1688_s11 = sld [smem:[#allocation5 + $0x31]] }
  0x9e   : > { %v340_v17 = vmul.f32 %v339_v13, %v1597_v12  ;;  %v471_v23 = vmul.f32 %v470_v20, %v1597_v12  ;;  %v600_v30 = vmul.f32 %v599_v26, %v1597_v12  ;;  %v726_v32 = vmul.f32 %v725_v28, %v1561_v47  ;;  %s1700_s14 = sld [smem:[#allocation5 + $0x2f]] }
  0x9f   : > { %v212_v2 = vrot.slane %v211_v56, 7  ;;  %v261_v15 = vstv %s1641_s30  ;;  %v923_v20 = vstv %s1645_s5  ;;  %s1727_s20 = sld [smem:[#allocation5 + $0x10]] }
  0xa0   : > { %v1552_v40 = vld [vmem:[#allocation2] sm:$0x7]  ;;  %s1350_s30 = sld [smem:[#allocation5 + $0x4a]] }
  0xa1   : > { %v265_v43 = vmul.f32 %v264_v38, %v1552_v40  ;;  %v1564_v49 = vmul.f32 %v204_v33, %v1552_v40  ;;  %v1572_v53 = vmul.f32 %v234_v44, %v1552_v40  ;;  %v399_v61 = vmul.f32 %v398_v57, %v1552_v40  ;;  %s1375_s5 = sld [smem:[#allocation5 + $0x55]] }
  0xa2   : > { %v1582_v63 = vmul.f32 %v244_v62, %v1552_v40  ;;  %v528_v11 = vmul.f32 %v527_v8, %v1552_v40  ;;  %v657_v25 = vmul.f32 %v656_v22, %v1552_v40  ;;  %v728_v33 = vstv %s1352_s12  ;;  %v221_v62 = vpop.permute.xlu0 %220  ;;  %s1693_s12 = sld [smem:[#allocation5 + $0x3c]] }
  0xa3   : > { %480 = vrot.lane.b32.xlu1 %v462_v41, %s1455_s15  ;;  %342 = vrot.lane.b32.xlu0 %v325_v42, %s1455_s15  ;;  %v271_v58 = vmul.f32 %v270_v54, %v1572_v53  ;;  %v405_v10 = vmul.f32 %v404_v7, %v1572_v53  ;;  %v534_v24 = vmul.f32 %v533_v21, %v1572_v53  ;;  %v857_v41 = vstv %s1366_s0  ;;  %s1851_s0 = sld [smem:[#allocation5 + $0x48]] }
  0xa4   : > { %284 = vrot.lane.b32.xlu2 %v265_v43, %s1455_s15  ;;  %v274_v4 = vmul.f32 %v273_v1, %v1582_v63  ;;  %v408_v18 = vmul.f32 %v407_v14, %v1582_v63  ;;  %v537_v31 = vmul.f32 %v536_v27, %v1582_v63  ;;  %v729_v37 = vmul.f32 %v728_v33, %v1597_v12 }
  0xa5   : > { %v663_v38 = vmul.f32 %v662_v35, %v1572_v53  ;;  %v786_v39 = vmul.f32 %v785_v36, %v1552_v40  ;;  %v665_v42 = vstv %s1345_s18  ;;  %v854_v43 = vstv %s1365_s19  ;;  %s1722_s19 = sld [smem:[#allocation5 + $0x38]]  ;;  %s1457_s18 = smov 124  }
  0xa6   : > { %v858_v44 = vmul.f32 %v857_v41, %v1597_v12  ;;  %v666_v45 = vmul.f32 %v665_v42, %v1582_v63  ;;  %v855_v46 = vmul.f32 %v854_v43, %v1561_v47  ;;  %v1112_v57 = vstv %s1393_s23  ;;  %s1336_s23 = sld [smem:[#allocation5 + $0x43]] }
  0xa7   : > { %v222_v1 = vrot.slane %v221_v62, 7  ;;  %v924_v27 = vmul.f32 %v923_v20, %v1582_v63  ;;  %v395_v35 = vstv %s1666_s8  ;;  %v584_v42 = vstv %s1673_s10  ;;  %s1389_s8 = sld [smem:[#allocation5 + $0x5c]] }
  0xa8   : > { %s1798_s10 = sld [smem:[#allocation5 + $0x3a]] }
  0xa9   : > { %v1647_v6 = vsel %vm223_vm10, %v222_v1, %v221_v62  ;;  %v1049_v62 = vstv %s1700_s14  ;;  %s1832_s14 = sld [smem:[#allocation5 + $0x25]] }
  0xaa   : > { %v1659_v14 = vmul.f32 %v1537_v29, %v1647_v6 }
  0xab   : > { %609 = vrot.lane.b32.xlu1 %v591_v50, %s1455_s15  ;;  %473 = vrot.lane.b32.xlu0 %v456_v51, %s1455_s15  ;;  %v791_v50 = vstv %s1358_s21  ;;  %v914_v51 = vstv %s1370_s22  ;;  %s1730_s21 = sld [smem:[#allocation5 + $0x16]] }
  0xac   : > { %356 = vrot.lane.b32.xlu2 %v337_v52, %s1455_s15  ;;  %v1044_v52 = vmul.f32 %v1043_v48, %v1552_v40  ;;  %v792_v54 = vmul.f32 %v791_v50, %v1572_v53  ;;  %v915_v55 = vmul.f32 %v914_v51, %v1552_v40  ;;  %s1312_s22 = sld [smem:[#allocation5 + $0x8]] }
  0xb2   : > { %v392_v20 = vstv %s1312_s22  ;;  %s1383_s22 = sld [smem:[#allocation5 + $0x2c]] }
  0xb3   : > { %738 = vrot.lane.b32.xlu1 %v720_v60, %s1455_s15  ;;  %291 = vrot.lane.b32.xlu0 %v271_v58, %s1455_s15  ;;  %v794_v58 = vstv %s1359_s24  ;;  %v1113_v60 = vmul.f32 %v1112_v57, %v1561_v47  ;;  %v986_v47 = vstv %s1380_s28  ;;  %s1354_s24 = sld [smem:[#allocation5 + $0x1d]] }
  0xb4   : > { %417 = vrot.lane.b32.xlu2 %v399_v61, %s1455_s15  ;;  %v795_v61 = vmul.f32 %v794_v58, %v1582_v63  ;;  %s1361_s28 = sld [smem:[#allocation5 + $0x4e]] }
  0xbb   : > { %867 = vrot.lane.b32.xlu1 %v849_v3, %s1455_s15  ;;  %306 = vrot.lane.b32.xlu0 %v274_v4, %s1456_s29  ;;  %v920_v4 = vstv %s1372_s26  ;;  %s1341_s26 = sld [smem:[#allocation5 + $0x17]] }
  0xbc   : > { %487 = vrot.lane.b32.xlu2 %v468_v5, %s1455_s15  ;;  %v258_v5 = vstv %s1298_s27  ;;  %v921_v7 = vmul.f32 %v920_v4, %v1572_v53  ;;  %s1368_s27 = sld [smem:[#allocation5 + $0x24]] }
  0xbd   : > { %v259_v8 = vmul.f32 %v258_v5, %v1564_v49 }
  0xc3   : > { %996 = vrot.lane.b32.xlu1 %v978_v9, %s1455_s15  ;;  %424 = vrot.lane.b32.xlu0 %v405_v10, %s1455_s15  ;;  %v214_v9 = vsel %vm213_vm11, %v212_v2, %v211_v56 }
  0xc4   : > { %546 = vrot.lane.b32.xlu2 %v528_v11, %s1455_s15  ;;  %v987_v11 = vmul.f32 %v986_v47, %v1597_v12  ;;  %v1653_v13 = vmul.f32 %v214_v9, %v1552_v40  ;;  %v1050_v47 = vmul.f32 %v1049_v62, %v1572_v53  ;;  %v722_v62 = vstv %s1350_s30  ;;  %s1311_s30 = sld [smem:[#allocation5 + $0x7]] }
  0xc6   : > { %v262_v21 = vmul.f32 %v261_v15, %v1653_v13  ;;  %v396_v43 = vmul.f32 %v395_v35, %v1653_v13 }
  0xcb   : > { %370 = vrot.lane.b32.xlu1 %v340_v17, %s1456_s29  ;;  %438 = vrot.lane.b32.xlu0 %v408_v18, %s1456_s29  ;;  %v333_v17 = vstv %s1643_s4  ;;  %s1382_s4 = sld [smem:[#allocation5 + $0x2b]] }
  0xcc   : > { %616 = vrot.lane.b32.xlu2 %v597_v19, %s1455_s15 }
  0xd3   : > { %501 = vrot.lane.b32.xlu1 %v471_v23, %s1456_s29  ;;  %553 = vrot.lane.b32.xlu0 %v534_v24, %s1455_s15  ;;  %v1115_v23 = vstv %s1394_s6  ;;  %v334_v24 = vmul.f32 %v333_v17, %v1659_v14  ;;  %v650_v17 = vstv %s1730_s21  ;;  %s1306_s6 = sld [smem:[#allocation5 + $0x33]] }
  0xd4   : > { %675 = vrot.lane.b32.xlu2 %v657_v25, %s1455_s15  ;;  %s1376_s21 = sld [smem:[#allocation5 + $0x56]] }
  0xdb   : > { %630 = vrot.lane.b32.xlu1 %v600_v30, %s1456_s29  ;;  %567 = vrot.lane.b32.xlu0 %v537_v31, %s1456_s29  ;;  %v1116_v30 = vmul.f32 %v1115_v23, %v1597_v12  ;;  %v1682_v31 = vmul.f32 %v1537_v29, %v214_v9  ;;  %v524_v9 = vstv %s1727_s20  ;;  %s1362_s20 = sld [smem:[#allocation5 + $0x4f]] }
  0xdc   : > { %745 = vrot.lane.b32.xlu2 %v726_v32, %s1455_s15  ;;  %v1103_v32 = vstv %s1663_s7  ;;  %v525_v53 = vmul.f32 %v524_v9, %v1653_v13  ;;  %s1355_s7 = sld [smem:[#allocation5 + $0x1e]] }
  0xdd   : > { %v1104_v41 = vmul.f32 %v1103_v32, %v1682_v31 }
  0xe3   : > { %759 = vrot.lane.b32.xlu1 %v729_v37, %s1456_s29  ;;  %682 = vrot.lane.b32.xlu0 %v663_v38, %s1455_s15  ;;  %v1052_v38 = vstv %s1670_s9  ;;  %s1795_s9 = sld [smem:[#allocation5 + $0x4]] }
  0xe4   : > { %804 = vrot.lane.b32.xlu2 %v786_v39, %s1455_s15  ;;  %v1053_v50 = vmul.f32 %v1052_v38, %v1582_v63  ;;  %v464_v63 = vstv %s1693_s12  ;;  %s1819_s12 = sld [smem:[#allocation5 + $0xb]] }
  0xeb   : > { %888 = vrot.lane.b32.xlu1 %v858_v44, %s1456_s29  ;;  %696 = vrot.lane.b32.xlu0 %v666_v45, %s1456_s29  ;;  %v1707_v45 = vld [vmem:[%s2154_s1] ss:$8 sm:$0x7] }
  0xec   : > { %874 = vrot.lane.b32.xlu2 %v855_v46, %s1455_s15 }
  0xf3   : > { %1062 = vrot.lane.b32.xlu1 %v1044_v52, %s1455_s15  ;;  %811 = vrot.lane.b32.xlu0 %v792_v54, %s1455_s15  ;;  %v585_v52 = vmul.f32 %v584_v42, %v1550_v34  ;;  %v1717_v54 = vmul.f32 %v1537_v29, %v1707_v45 }
  0xf4   : > { %933 = vrot.lane.b32.xlu2 %v915_v55, %s1455_s15  ;;  %v321_v55 = vstv %s1688_s11  ;;  %s1803_s11 = sld [smem:[#allocation5 + $0x51]] }
  0xfb   : > { %1132 = vrot.lane.b32.xlu1 %v1113_v60, %s1455_s15  ;;  %825 = vrot.lane.b32.xlu0 %v795_v61, %s1456_s29  ;;  %v521_v60 = vstv %s1696_s13  ;;  %v322_v61 = vmul.f32 %v321_v55, %v1717_v54  ;;  %s1823_s13 = sld [smem:[#allocation5 + $0x41]] }
  0xfc   : > { %1003 = vrot.lane.b32.xlu2 %v984_v0, %s1455_s15  ;;  %v465_v0 = vmul.f32 %v464_v63, %v1659_v14  ;;  %v522_v4 = vmul.f32 %v521_v60, %v1564_v49  ;;  %v842_v63 = vstv %s1361_s28  ;;  %s1392_s28 = sld [smem:[#allocation5 + $0x5f]] }
  0xfe   : > { %v285_v3 = vpop.permute.xlu2 %284 }
  0xff   : > { %v286_v10 = vrot.slane %v285_v3, 1 }
 0x101   : > { %v287_v18 = vsel %vm279_vm12, %v285_v3, %v286_v10 }
 0x102   : > { %v289_v25 = vadd.f32 %v287_v18, %v262_v21 }
 0x103   : > { %940 = vrot.lane.b32.xlu0 %v921_v7, %s1455_s15  ;;  %276 = vrot.lane.b32.xlu1 %v259_v8, %s1455_s15  ;;  %v452_v7 = vstv %s1722_s19  ;;  %s1343_s19 = sld [smem:[#allocation5 + $0x19]] }
 0x104   : > { %1017 = vrot.lane.b32.xlu2 %v987_v11, %s1456_s29 }
 0x106   : > { %v357_v19 = vpop.permute.xlu2 %356 }
 0x107   : > { %v358_v22 = vrot.slane %v357_v19, 1 }
 0x109   : > { %v359_v26 = vsel %vm279_vm12, %v357_v19, %v358_v22  ;;  %v453_v19 = vmul.f32 %v452_v7, %v1717_v54  ;;  %v723_v7 = vmul.f32 %v722_v62, %v1659_v14 }
 0x10a   : > { %v1678_v28 = vadd.f32 %v359_v26, %v334_v24  ;;  %v651_v24 = vmul.f32 %v650_v17, %v1564_v49  ;;  %v393_v26 = vmul.f32 %v392_v20, %v1564_v49  ;;  %v782_v20 = vstv %s1355_s7  ;;  %s2047_s7 = sld [smem:[#allocation5 + $0x4d]] }
 0x10b   : > { %298 = vrot.lane.b32.xlu0 %v289_v25, %s1456_s29  ;;  %954 = vrot.lane.b32.xlu1 %v924_v27, %s1456_s29 }
 0x10c   : > { %1146 = vrot.lane.b32.xlu2 %v1116_v30, %s1456_s29  ;;  %v593_v30 = vstv %s1336_s23  ;;  %s1357_s23 = sld [smem:[#allocation5 + $0x20]] }
 0x10d   : > { %v1690_v33 = vpop.permute.xlu1 %349  ;;  %v1126_v36 = vpop.permute.xlu0 %1125  ;;  %v594_v38 = vmul.f32 %v593_v30, %v1659_v14 }
 0x10e   : > { %v418_v12 = vpop.permute.xlu2 %417  ;;  %v1127_v37 = vrot.slane %v1126_v36, 1 }
 0x10f   : > { %v419_v39 = vrot.slane %v418_v12, 1 }
 0x110   : > { %v1128_v44 = vsel %vm279_vm12, %v1126_v36, %v1127_v37  ;;  %v779_v36 = vstv %s1354_s24  ;;  %v713_v37 = vstv %s1347_s25  ;;  %s1332_s24 = sld [smem:[#allocation5 + $0x3f]] }
 0x111   : > { %v420_v46 = vsel %vm279_vm12, %v418_v12, %v419_v39  ;;  %v1710_v48 = vadd.f32 %v1128_v44, %v1104_v41  ;;  %v780_v41 = vmul.f32 %v779_v36, %v1564_v49  ;;  %s254_s25 = sld [smem:[#allocation5]] }
 0x112   : > { %v422_v51 = vadd.f32 %v420_v46, %v396_v43  ;;  %v714_v43 = vmul.f32 %v713_v37, %v1550_v34  ;;  %v653_v46 = vstv %s1341_s26  ;;  %s1371_s26 = sld [smem:[#allocation5 + $0x27]] }
 0x113   : > { %1083 = vrot.lane.b32.xlu1 %v1053_v50, %s1456_s29 }
 0x114   : > { %602 = vrot.lane.b32.xlu2 %v585_v52, %s1455_s15  ;;  %431 = vrot.lane.b32.xlu0 %v422_v51, %s1456_s29  ;;  %v908_v52 = vstv %s1368_s27  ;;  %s1378_s27 = sld [smem:[#allocation5 + $0x58]] }
 0x115   : > { %v1724_v56 = vpop.permute.xlu1 %480  ;;  %v343_v57 = vpop.permute.xlu0 %342 }
 0x116   : > { %v488_v58 = vpop.permute.xlu2 %487  ;;  %v344_v59 = vrot.slane %v343_v57, 1 }
 0x117   : > { %v489_v29 = vrot.slane %v488_v58, 1 }
 0x118   : > { %v345_v1 = vsel %vm279_vm12, %v343_v57, %v344_v59  ;;  %v654_v57 = vmul.f32 %v653_v46, %v1653_v13  ;;  %v909_v59 = vmul.f32 %v908_v52, %v1564_v49 }
 0x119   : > { %v490_v2 = vsel %vm279_vm12, %v488_v58, %v489_v29  ;;  %v1737_v3 = vadd.f32 %v345_v1, %v322_v61  ;;  %v843_v29 = vmul.f32 %v842_v63, %v1550_v34 }
 0x11a   : > { %v1740_v5 = vadd.f32 %v490_v2, %v465_v0  ;;  %v1037_v2 = vstv %s1382_s4  ;;  %s2009_s4 = sld [smem:[#allocation5 + $0xe]] }
 0x11b   : > { %539 = vrot.lane.b32.xlu1 %v522_v4, %s1455_s15 }
 0x11c   : > { %1069 = vrot.lane.b32.xlu2 %v1050_v47, %s1455_s15  ;;  %v971_v47 = vstv %s1375_s5  ;;  %s2025_s5 = sld [smem:[#allocation5 + $0x46]] }
 0x11d   : > { %v1746_v8 = vpop.permute.xlu1 %609  ;;  %v474_v10 = vpop.permute.xlu0 %473  ;;  %v972_v17 = vmul.f32 %v971_v47, %v1550_v34  ;;  %v401_v47 = vstv %s1819_s12  ;;  %s2099_s12 = sld [smem:[#allocation5 + $0x2a]] }
 0x11e   : > { %v547_v11 = vpop.permute.xlu2 %546  ;;  %v475_v15 = vrot.slane %v474_v10, 1 }
 0x11f   : > { %v548_v18 = vrot.slane %v547_v11, 1 }
 0x120   : > { %v476_v21 = vsel %vm279_vm12, %v474_v10, %v475_v15  ;;  %v1038_v10 = vmul.f32 %v1037_v2, %v1564_v49 }
 0x121   : > { %v549_v22 = vsel %vm279_vm12, %v547_v11, %v548_v18  ;;  %v1754_v23 = vadd.f32 %v476_v21, %v453_v19  ;;  %v351_v11 = vrot.slane %v1690_v33, 1  ;;  %v327_v18 = vstv %s1306_s6  ;;  %s2029_s6 = sld [smem:[#allocation5 + $0x15]] }
 0x122   : > { %v551_v25 = vadd.f32 %v549_v22, %v525_v53  ;;  %v328_v22 = vmul.f32 %v327_v18, %v1682_v31 }
 0x123   : > { %668 = vrot.lane.b32.xlu1 %v651_v24, %s1455_s15  ;;  %v352_v53 = vsel %vm279_vm12, %v1690_v33, %v351_v11  ;;  %v482_v33 = vrot.slane %v1724_v56, 1  ;;  %v911_v11 = vstv %s1832_s14  ;;  %s1459_s14 = smov 96  }
 0x124   : > { %560 = vrot.lane.b32.xlu0 %v551_v25, %s1456_s29  ;;  %410 = vrot.lane.b32.xlu2 %v393_v26, %s1455_s15  ;;  %v1100_v25 = vstv %s1389_s8  ;;  %v783_v26 = vmul.f32 %v782_v20, %v1653_v13  ;;  %v354_v30 = vadd.f32 %v352_v53, %v328_v22  ;;  %s2051_s8 = sld [smem:[#allocation5 + $0x1c]] }
 0x125   : > { %v1761_v27 = vpop.permute.xlu1 %738  ;;  %v1763_v32 = vpop.permute.xlu0 %291  ;;  %v483_v52 = vsel %vm279_vm12, %v1724_v56, %v482_v33  ;;  %v611_v56 = vrot.slane %v1746_v8, 1 }
 0x126   : > { %v617_v35 = vpop.permute.xlu2 %616 }
 0x127   : > { %v618_v12 = vrot.slane %v617_v35, 1  ;;  %v612_v18 = vsel %vm279_vm12, %v1746_v8, %v611_v56 }
 0x129   : > { %v619_v39 = vsel %vm279_vm12, %v617_v35, %v618_v12  ;;  %v293_v35 = vrot.slane %v1763_v32, 1  ;;  %v1813_v12 = vmul.f32 %v1647_v6, %v1552_v40 }
 0x12a   : > { %v1768_v42 = vadd.f32 %v619_v39, %v594_v38  ;;  %v1101_v38 = vmul.f32 %v1100_v25, %v1550_v34  ;;  %v267_v39 = vstv %s1795_s9  ;;  %v851_v34 = vstv %s1803_s11  ;;  %s2072_s9 = sld [smem:[#allocation5 + $0x54]] }
 0x12b   : > { %797 = vrot.lane.b32.xlu1 %v780_v41, %s1455_s15  ;;  %v294_v6 = vsel %vm279_vm12, %v1763_v32, %v293_v35  ;;  %v402_v20 = vmul.f32 %v401_v47, %v1813_v12  ;;  %s2096_s11 = sld [smem:[#allocation5 + $0x5b]] }
 0x12c   : > { %731 = vrot.lane.b32.xlu2 %v714_v43, %s1455_s15  ;;  %v458_v43 = vstv %s1798_s10  ;;  %s2075_s10 = sld [smem:[#allocation5 + $0x23]] }
 0x12d   : > { %v1773_v44 = vpop.permute.xlu1 %867  ;;  %v1775_v50 = vpop.permute.xlu0 %306 }
 0x12e   : > { %v676_v51 = vpop.permute.xlu2 %675  ;;  %v308_v41 = vrot.slane %v1775_v50, 1 }
 0x12f   : > { %v677_v55 = vrot.slane %v676_v51, 1 }
 0x131   : > { %v678_v58 = vsel %vm279_vm12, %v676_v51, %v677_v55  ;;  %v268_v55 = vmul.f32 %v267_v39, %v1813_v12  ;;  %v716_v39 = vstv %s1851_s0  ;;  %s1289_s0 = sshll.u32 %s2164_s17, 1 }
 0x132   : > { %v680_v60 = vadd.f32 %v678_v58, %v654_v57  ;;  %v459_v57 = vmul.f32 %v458_v43, %v1682_v31  ;;  %v309_v58 = vsel %vm301_vm13, %v1775_v50, %v308_v41  ;;  %v587_v50 = vstv %s1823_s13  ;;  %s1458_s13 = smov 112  }
 0x133   : > { %926 = vrot.lane.b32.xlu1 %v909_v59, %s1455_s15  ;;  %v296_v59 = vadd.f32 %v294_v6, %v268_v55  ;;  %v717_v55 = vmul.f32 %v716_v39, %v1682_v31 }
 0x134   : > { %689 = vrot.lane.b32.xlu0 %v680_v60, %s1456_s29  ;;  %860 = vrot.lane.b32.xlu2 %v843_v29, %s1455_s15  ;;  %v852_v60 = vmul.f32 %v851_v34, %v1659_v14  ;;  %v485_v29 = vadd.f32 %v483_v52, %v459_v57 }
 0x135   : > { %v1784_v61 = vpop.permute.xlu1 %996  ;;  %v1786_v0 = vpop.permute.xlu0 %424  ;;  %v311_v2 = vadd.f32 %v309_v58, %v296_v59  ;;  %v869_v59 = vrot.slane %v1773_v44, 1 }
 0x136   : > { %v746_v1 = vpop.permute.xlu2 %745  ;;  %v426_v62 = vrot.slane %v1786_v0, 1 }
 0x137   : > { %v747_v4 = vrot.slane %v746_v1, 1 }
 0x139   : > { %v748_v9 = vsel %vm279_vm12, %v746_v1, %v747_v4 }
 0x13a   : > { %v1792_v15 = vadd.f32 %v748_v9, %v723_v7  ;;  %v427_v9 = vsel %vm279_vm12, %v1786_v0, %v426_v62  ;;  %v912_v0 = vmul.f32 %v911_v11, %v1653_v13 }
 0x13b   : > { %1055 = vrot.lane.b32.xlu1 %v1038_v10, %s1455_s15  ;;  %v429_v25 = vadd.f32 %v427_v9, %v402_v20  ;;  %v998_v20 = vrot.slane %v1784_v61, 1 }
 0x13c   : > { %989 = vrot.lane.b32.xlu2 %v972_v17, %s1455_s15 }
 0x13d   : > { %v1801_v19 = vpop.permute.xlu1 %370  ;;  %v439_v49 = vpop.permute.xlu0 %438 }
 0x13e   : > { %v805_v21 = vpop.permute.xlu2 %804  ;;  %v440_v7 = vrot.slane %v439_v49, 1 }
 0x13f   : > { %v806_v24 = vrot.slane %v805_v21, 1 }
 0x140   : > { %v441_v22 = vsel %vm301_vm13, %v439_v49, %v440_v7 }
 0x141   : > { %v807_v36 = vsel %vm279_vm12, %v805_v21, %v806_v24  ;;  %v588_v21 = vmul.f32 %v587_v50, %v1682_v31  ;;  %v443_v33 = vadd.f32 %v441_v22, %v429_v25 }
 0x142   : > { %v809_v37 = vadd.f32 %v807_v36, %v783_v26  ;;  %v740_v36 = vrot.slane %v1761_v27, 1 }
 0x143   : > { %363 = vrot.lane.b32.xlu1 %v354_v30, %s1456_s29  ;;  %v614_v26 = vadd.f32 %v612_v18, %v588_v21  ;;  %v1040_v21 = vstv %s1383_s22 }
 0x144   : > { %818 = vrot.lane.b32.xlu0 %v809_v37, %s1456_s29  ;;  %1118 = vrot.lane.b32.xlu2 %v1101_v38, %s1455_s15  ;;  %s1847_s15 = sld [smem:[#allocation5 + $0x12]]  ;;  %v741_v6 = vsel %vm279_vm12, %v1761_v27, %v740_v36 }
 0x145   : > { %v1829_v46 = vpop.permute.xlu1 %501  ;;  %v554_v51 = vpop.permute.xlu0 %553 }
 0x146   : > { %v875_v63 = vpop.permute.xlu2 %874  ;;  %v555_v30 = vrot.slane %v554_v51, 1 }
 0x147   : > { %v876_v32 = vrot.slane %v875_v63, 1 }
 0x148   : > { %v556_v49 = vsel %vm279_vm12, %v554_v51, %v555_v30  ;;  %v1041_v30 = vmul.f32 %v1040_v21, %v1653_v13  ;;  %v581_v13 = vstv %s1332_s24 }
 0x149   : > { %v877_v1 = vsel %vm279_vm12, %v875_v63, %v876_v32  ;;  %v743_v32 = vadd.f32 %v741_v6, %v717_v55 }
 0x14a   : > { %v1844_v4 = vadd.f32 %v877_v1, %v852_v60  ;;  %v530_v37 = vstv %s1847_s15  ;;  %v659_v60 = vstv %s1343_s19  ;;  %s1460_s15 = smov 64  }
 0x14b   : > { %494 = vrot.lane.b32.xlu1 %v485_v29, %s1456_s29  ;;  %v531_v34 = vmul.f32 %v530_v37, %v1813_v12  ;;  %v845_v29 = vstv %s1362_s20  ;;  %v660_v62 = vmul.f32 %v659_v60, %v1813_v12  ;;  %v372_v37 = vrot.slane %v1801_v19, 1  ;;  %s150_s20 = scalar_lea.vmem %s2156_s3, %s1289_s0 }
 0x14c   : > { %313 = vrot.lane.b32.xlu2 %v311_v2, %s1457_s18  ;;  %v870_v2 = vsel %vm279_vm12, %v1773_v44, %v869_v59  ;;  %v846_v50 = vmul.f32 %v845_v29, %v1682_v31  ;;  %v503_v60 = vrot.slane %v1829_v46, 1 }
 0x14d   : > { %v1856_v10 = vpop.permute.xlu1 %630  ;;  %v568_v17 = vpop.permute.xlu0 %567  ;;  %v558_v57 = vadd.f32 %v556_v49, %v531_v34 }
 0x14e   : > { %v934_v53 = vpop.permute.xlu2 %933  ;;  %v569_v38 = vrot.slane %v568_v17, 1 }
 0x14f   : > { %v935_v24 = vrot.slane %v934_v53, 1 }
 0x150   : > { %v570_v63 = vsel %vm301_vm13, %v568_v17, %v569_v38  ;;  %v872_v17 = vadd.f32 %v870_v2, %v846_v50  ;;  %v788_v38 = vstv %s1357_s23 }
 0x151   : > { %v936_v35 = vsel %vm279_vm12, %v934_v53, %v935_v24  ;;  %v572_v51 = vadd.f32 %v570_v63, %v558_v57  ;;  %v974_v53 = vstv %s1376_s21  ;;  %v999_v24 = vsel %vm279_vm12, %v1784_v61, %v998_v20 }
 0x152   : > { %v938_v8 = vadd.f32 %v936_v35, %v912_v0  ;;  %v789_v39 = vmul.f32 %v788_v38, %v1813_v12  ;;  %v582_v57 = vmul.f32 %v581_v13, %v1717_v54 }
 0x153   : > { %623 = vrot.lane.b32.xlu1 %v614_v26, %s1456_s29  ;;  %v975_v26 = vmul.f32 %v974_v53, %v1682_v31 }
 0x154   : > { %947 = vrot.lane.b32.xlu0 %v938_v8, %s1456_s29  ;;  %445 = vrot.lane.b32.xlu2 %v443_v33, %s1457_s18 }
 0x155   : > { %v1873_v41 = vpop.permute.xlu1 %759  ;;  %v683_v43 = vpop.permute.xlu0 %682  ;;  %v1001_v33 = vadd.f32 %v999_v24, %v975_v26 }
 0x156   : > { %v1878_v52 = vpop.permute.xlu2 %1003  ;;  %v684_v58 = vrot.slane %v683_v43, 1  ;;  %v761_v26 = vrot.slane %v1873_v41, 1 }
 0x157   : > { %v1005_v13 = vrot.slane %v1878_v52, 1 }
 0x158   : > { %v685_v27 = vsel %vm279_vm12, %v683_v43, %v684_v58  ;;  %v373_v43 = vsel %vm301_vm13, %v1801_v19, %v372_v37  ;;  %v1926_v19 = vmul.f32 %v1707_v45, %v1552_v40  ;;  %v632_v40 = vrot.slane %v1856_v10, 1 }
 0x159   : > { %v687_v9 = vadd.f32 %v685_v27, %v660_v62  ;;  %v917_v45 = vstv %s1371_s26 }
 0x15a   : > { %v633_v53 = vsel %vm301_vm13, %v1856_v10, %v632_v40 }
 0x15b   : > { %752 = vrot.lane.b32.xlu1 %v743_v32, %s1456_s29  ;;  %v375_v32 = vadd.f32 %v373_v43, %v1678_v28  ;;  %v255_v28 = vstv %s254_s25  ;;  %v635_v24 = vadd.f32 %v633_v53, %v1768_v42 }
 0x15c   : > { %574 = vrot.lane.b32.xlu2 %v572_v51, %s1457_s18 }
 0x15d   : > { %v1887_v1 = vpop.permute.xlu1 %888  ;;  %v697_v56 = vpop.permute.xlu0 %696 }
 0x15e   : > { %v1891_v47 = vpop.permute.xlu2 %1017  ;;  %v698_v7 = vrot.slane %v697_v56, 1 }
 0x15f   : > { %v1019_v43 = vrot.slane %v1891_v47, 1 }
 0x160   : > { %v699_v11 = vsel %vm301_vm13, %v697_v56, %v698_v7  ;;  %v504_v56 = vsel %vm301_vm13, %v1829_v46, %v503_v60  ;;  %v256_v7 = vmul.f32 %v255_v28, %v1926_v19  ;;  %v918_v46 = vmul.f32 %v917_v45, %v1813_v12 }
 0x161   : > { %v701_v18 = vadd.f32 %v699_v11, %v687_v9 }
 0x163   : > { %881 = vrot.lane.b32.xlu1 %v872_v17, %s1456_s29 }
 0x164   : > { %703 = vrot.lane.b32.xlu2 %v701_v18, %s1457_s18 }
 0x165   : > { %v1063_v44 = vpop.permute.xlu1 %1062  ;;  %v812_v22 = vpop.permute.xlu0 %811 }
 0x166   : > { %v1064_v25 = vrot.slane %v1063_v44, 1  ;;  %v1900_v0 = vpop.permute.xlu2 %1146  ;;  %v813_v36 = vrot.slane %v812_v22, 1 }
 0x168   : > { %v1065_v35 = vsel %vm279_vm12, %v1063_v44, %v1064_v25  ;;  %v814_v61 = vsel %vm279_vm12, %v812_v22, %v813_v36 }
 0x169   : > { %v1067_v8 = vadd.f32 %v1065_v35, %v1041_v30  ;;  %v816_v55 = vadd.f32 %v814_v61, %v789_v39  ;;  %v890_v39 = vrot.slane %v1887_v1, 1 }
 0x16b   : > { %1076 = vrot.lane.b32.xlu0 %v1067_v8, %s1456_s29  ;;  %1010 = vrot.lane.b32.xlu1 %v1001_v33, %s1456_s29  ;;  %v762_v33 = vsel %vm301_vm13, %v1873_v41, %v761_v26 }
 0x16c   : > { %v764_v38 = vadd.f32 %v762_v33, %v1792_v15  ;;  %v1006_v15 = vsel %vm279_vm12, %v1878_v52, %v1005_v13 }
 0x16d   : > { %v1910_v31 = vpop.permute.xlu1 %1132  ;;  %v826_v49 = vpop.permute.xlu0 %825 }
 0x16e   : > { %v603_v6 = vpop.permute.xlu2 %602  ;;  %v827_v34 = vrot.slane %v826_v49, 1 }
 0x16f   : > { %v604_v63 = vrot.slane %v603_v6, 1 }
 0x170   : > { %v828_v58 = vsel %vm301_vm13, %v826_v49, %v827_v34  ;;  %v980_v49 = vstv %s1378_s27  ;;  %v1020_v34 = vsel %vm301_vm13, %v1891_v47, %v1019_v43 }
 0x171   : > { %v605_v59 = vsel %vm279_vm12, %v603_v6, %v604_v63  ;;  %v830_v51 = vadd.f32 %v828_v58, %v816_v55  ;;  %v981_v6 = vmul.f32 %v980_v49, %v1659_v14  ;;  %v1109_v63 = vstv %s1392_s28 }
 0x172   : > { %v1919_v29 = vadd.f32 %v605_v59, %v582_v57  ;;  %v1110_v58 = vmul.f32 %v1109_v63, %v1659_v14 }
 0x173   : > { %377 = vrot.lane.b32.xlu0 %v375_v32, %s1457_s18  ;;  %1139 = vrot.lane.b32.xlu1 %v1710_v48, %s1456_s29  ;;  %v506_v48 = vadd.f32 %v504_v56, %v1740_v5  ;;  %s1385_s29 = sld [smem:[#allocation5 + $0x2e]]  ;;  %v1008_v55 = vadd.f32 %v1006_v15, %v981_v6  ;;  %v1148_v32 = vrot.slane %v1900_v0, 1 }
 0x174   : > { %832 = vrot.lane.b32.xlu2 %v830_v51, %s1457_s18 }
 0x175   : > { %v277_v27 = vpop.permute.xlu1 %276  ;;  %v941_v62 = vpop.permute.xlu0 %940  ;;  %v1022_v57 = vadd.f32 %v1020_v34, %v1008_v55  ;;  %v1149_v59 = vsel %vm301_vm13, %v1900_v0, %v1148_v32  ;;  %v518_v32 = vstv %s2009_s4 }
 0x176   : > { %v278_v2 = vrot.slane %v277_v27, 1  ;;  %v942_v9 = vrot.slane %v941_v62, 1  ;;  %v1070_v18 = vpop.permute.xlu2 %1069 }
 0x177   : > { %v1071_v5 = vrot.slane %v1070_v18, 1 }
 0x178   : > { %v280_v50 = vsel %vm279_vm12, %v277_v27, %v278_v2  ;;  %v943_v17 = vsel %vm279_vm12, %v941_v62, %v942_v9 }
 0x179   : > { %v1934_v11 = vadd.f32 %v280_v50, %v256_v7  ;;  %v945_v44 = vadd.f32 %v943_v17, %v918_v46  ;;  %v1046_v30 = vstv %s1385_s29  ;;  %v1072_v35 = vsel %vm279_vm12, %v1070_v18, %v1071_v5 }
 0x17a   : > { %v1047_v36 = vmul.f32 %v1046_v30, %v1813_v12  ;;  %v891_v12 = vsel %vm301_vm13, %v1887_v1, %v890_v39  ;;  %v1134_v1 = vrot.slane %v1910_v31, 1 }
 0x17b   : > { %508 = vrot.lane.b32.xlu0 %v506_v48, %s1457_s18  ;;  %v893_v41 = vadd.f32 %v891_v12, %v1844_v4 }
 0x17c   : > { %v1074_v37 = vadd.f32 %v1072_v35, %v1047_v36  ;;  %v1135_v4 = vsel %vm279_vm12, %v1910_v31, %v1134_v1 }
 0x17d   : > { %v955_v20 = vpop.permute.xlu1 %954  ;;  %v1137_v52 = vadd.f32 %v1135_v4, %v1110_v58  ;;  %v299_v27 = vpop.permute.xlu0 %298 }
 0x17e   : > { %v956_v21 = vrot.slane %v955_v20, 1  ;;  %v411_v60 = vpop.permute.xlu2 %410  ;;  %v300_v53 = vrot.slane %v299_v27, 1 }
 0x17f   : > { %v1151_v47 = vadd.f32 %v1149_v59, %v1137_v52  ;;  %v412_v30 = vrot.slane %v411_v60, 1 }
 0x180   : > { %v957_v22 = vsel %vm301_vm13, %v955_v20, %v956_v21 }
 0x181   : > { %v959_v25 = vadd.f32 %v957_v22, %v945_v44  ;;  %v302_v22 = vsel %vm301_vm13, %v299_v27, %v300_v53  ;;  %v413_v12 = vsel %vm279_vm12, %v411_v60, %v412_v30 }
 0x183   : > { %637 = vrot.lane.b32.xlu0 %v635_v24, %s1457_s18  ;;  %961 = vrot.lane.b32.xlu2 %v959_v25, %s1457_s18 }
 0x185   : > { %v1084_v10 = vpop.permute.xlu1 %1083 }
 0x186   : > { %v1085_v8 = vrot.slane %v1084_v10, 1  ;;  %v1980_v31 = vpop.permute.xlu2 %731  ;;  %v432_v62 = vpop.permute.xlu0 %431 }
 0x188   : > { %v1086_v42 = vsel %vm301_vm13, %v1084_v10, %v1085_v8  ;;  %v304_v10 = vadd.f32 %v302_v22, %v1934_v11  ;;  %v389_v8 = vstv %s1311_s30 }
 0x189   : > { %v1088_v61 = vadd.f32 %v1086_v42, %v1074_v37  ;;  %v433_v37 = vrot.slane %v432_v62, 1 }
 0x18b   : > { %766 = vrot.lane.b32.xlu0 %v764_v38, %s1457_s18  ;;  %1090 = vrot.lane.b32.xlu2 %v1088_v61, %s1457_s18  ;;  %v434_v43 = vsel %vm301_vm13, %v432_v62, %v433_v37 }
 0x18d   : > { %v1975_v51 = vpop.permute.xlu1 %539 }
 0x18e   : > { %v1984_v56 = vpop.permute.xlu2 %860  ;;  %v541_v1 = vrot.slane %v1975_v51, 1 }
 0x190   : > { %v542_v62 = vsel %vm279_vm12, %v1975_v51, %v541_v1  ;;  %v733_v51 = vrot.slane %v1980_v31, 1 }
 0x193   : > { %895 = vrot.lane.b32.xlu0 %v893_v41, %s1457_s18 }
 0x195   : > { %v1978_v28 = vpop.permute.xlu1 %668 }
 0x196   : > { %v1986_v2 = vpop.permute.xlu0 %560  ;;  %v1990_v0 = vpop.permute.xlu2 %989 }
 0x197   : > { %v562_v52 = vrot.slane %v1986_v2, 1 }
 0x19b   : > { %1024 = vrot.lane.b32.xlu0 %v1022_v57, %s1457_s18 }
 0x19d   : > { %v1982_v14 = vpop.permute.xlu1 %797 }
 0x19e   : > { %v1996_v48 = vpop.permute.xlu2 %1118  ;;  %v799_v1 = vrot.slane %v1982_v14, 1 }
 0x1a3   : > { %1153 = vrot.lane.b32.xlu0 %v1151_v47, %s1457_s18 }
 0x1a5   : > { %v1988_v7 = vpop.permute.xlu1 %926 }
 0x1a6   : > { %v1992_v50 = vpop.permute.xlu0 %689  ;;  %v314_v18 = vpop.permute.xlu2 %313 }
 0x1a7   : > { %v315_v5 = vrot.slane %v314_v18, 1 }
 0x1a9   : > { %v317_v35 = vsel %vm316_vm14, %v314_v18, %v315_v5  ;;  %v519_v18 = vmul.f32 %v518_v32, %v1926_v19 }
 0x1aa   : > { %v319_v61 = vadd.f32 %v317_v35, %v304_v10  ;;  %v710_v35 = vstv %s2025_s5  ;;  %v691_v10 = vrot.slane %v1992_v50, 1 }
 0x1ad   : > { %v1994_v9 = vpop.permute.xlu1 %1055 }
 0x1ae   : > { %v446_v44 = vpop.permute.xlu2 %445 }
 0x1af   : > { %v447_v13 = vrot.slane %v446_v44, 1 }
 0x1b1   : > { %v448_v55 = vsel %vm316_vm14, %v446_v44, %v447_v13  ;;  %v544_v44 = vadd.f32 %v542_v62, %v519_v18  ;;  %v800_v62 = vsel %vm279_vm12, %v1982_v14, %v799_v1 }
 0x1b5   : > { %v364_v45 = vpop.permute.xlu1 %363 }
 0x1b6   : > { %v1998_v40 = vpop.permute.xlu0 %818  ;;  %v365_v21 = vrot.slane %v364_v45, 1  ;;  %v575_v11 = vpop.permute.xlu2 %574 }
 0x1b7   : > { %v820_v32 = vrot.slane %v1998_v40, 1 }
 0x1b8   : > { %v366_v24 = vsel %vm301_vm13, %v364_v45, %v365_v21  ;;  %v576_v45 = vrot.slane %v575_v11, 1 }
 0x1b9   : > { %v368_v33 = vadd.f32 %v366_v24, %v1737_v3  ;;  %v390_v3 = vmul.f32 %v389_v8, %v1926_v19  ;;  %v670_v24 = vrot.slane %v1978_v28, 1 }
 0x1bb   : > { %v415_v6 = vadd.f32 %v413_v12, %v390_v3 }
 0x1bd   : > { %v495_v46 = vpop.permute.xlu1 %494  ;;  %v436_v57 = vadd.f32 %v434_v43, %v415_v6 }
 0x1be   : > { %v496_v42 = vrot.slane %v495_v46, 1  ;;  %v704_v5 = vpop.permute.xlu2 %703 }
 0x1bf   : > { %v450_v60 = vadd.f32 %v448_v55, %v436_v57  ;;  %v705_v12 = vrot.slane %v704_v5, 1 }
 0x1c0   : > { %v497_v15 = vsel %vm301_vm13, %v495_v46, %v496_v42 }
 0x1c1   : > { %v499_v4 = vadd.f32 %v497_v15, %v1754_v23  ;;  %v563_v23 = vsel %vm301_vm13, %v1986_v2, %v562_v52  ;;  %v706_v55 = vsel %vm316_vm14, %v704_v5, %v705_v12 }
 0x1c2   : > { %v565_v2 = vadd.f32 %v563_v23, %v544_v44  ;;  %v821_v44 = vsel %vm301_vm13, %v1998_v40, %v820_v32  ;;  %v968_v40 = vstv %s2072_s9 }
 0x1c5   : > { %v624_v25 = vpop.permute.xlu1 %623 }
 0x1c6   : > { %v2000_v17 = vpop.permute.xlu0 %947  ;;  %v625_v59 = vrot.slane %v624_v25, 1 }
 0x1c8   : > { %v626_v53 = vsel %vm301_vm13, %v624_v25, %v625_v59 }
 0x1c9   : > { %v628_v25 = vadd.f32 %v626_v53, %v1919_v29  ;;  %v711_v29 = vmul.f32 %v710_v35, %v1717_v54 }
 0x1cd   : > { %v753_v58 = vpop.permute.xlu1 %752 }
 0x1ce   : > { %v833_v6 = vpop.permute.xlu2 %832 }
 0x1d5   : > { %v882_v42 = vpop.permute.xlu1 %881 }
 0x1d6   : > { %v883_v52 = vrot.slane %v882_v42, 1 }
 0x1d8   : > { %v884_v5 = vsel %vm301_vm13, %v882_v42, %v883_v52 }
 0x1dd   : > { %v2002_v20 = vpop.permute.xlu0 %1076  ;;  %v1011_v23 = vpop.permute.xlu1 %1010 }
 0x1e5   : > { %v378_v26 = vpop.permute.xlu0 %377 }
 0x1e6   : > { %v379_v36 = vrot.slane %v378_v26, 1 }
 0x1e8   : > { %v380_v38 = vsel %vm316_vm14, %v378_v26, %v379_v36  ;;  %v577_v26 = vsel %vm316_vm14, %v575_v11, %v576_v45  ;;  %v647_v36 = vstv %s2029_s6  ;;  %v692_v11 = vsel %vm301_vm13, %v1992_v50, %v691_v10 }
 0x1e9   : > { %v382_v39 = vadd.f32 %v380_v38, %v368_v33  ;;  %v754_v33 = vrot.slane %v753_v58, 1  ;;  %v579_v37 = vadd.f32 %v577_v26, %v565_v2  ;;  %v648_v13 = vmul.f32 %v647_v36, %v1926_v19 }
 0x1ea   : > { %v839_v50 = vstv %s2047_s7  ;;  %v834_v45 = vrot.slane %v833_v6, 1  ;;  %v991_v26 = vrot.slane %v1990_v0, 1  ;;  %v905_v10 = vstv %s2075_s10 }
 0x1eb   : > { %v383_v49 = vadd.f32 %v382_v39, %v319_v61  ;;  %v734_v61 = vsel %vm279_vm12, %v1980_v31, %v733_v51  ;;  %v671_v39 = vsel %vm279_vm12, %v1978_v28, %v670_v24  ;;  %v840_v18 = vmul.f32 %v839_v50, %v1717_v54  ;;  %v962_v24 = vpop.permute.xlu2 %961 }
 0x1ec   : > { %v736_v15 = vadd.f32 %v734_v61, %v711_v29  ;;  %v673_v31 = vadd.f32 %v671_v39, %v648_v13  ;;  %v835_v35 = vsel %vm316_vm14, %v833_v6, %v834_v45  ;;  %v992_v61 = vsel %vm279_vm12, %v1990_v0, %v991_v26  ;;  %v1140_v0 = vpop.permute.xlu1 %1139 }
 0x1ed   : > { %386 = vst.msk [vmem:[#allocation3] sm:$0x7] %vm2014_vm15, %v383_v49  ;;  %v509_v34 = vpop.permute.xlu0 %508  ;;  %v755_v49 = vsel %vm301_vm13, %v753_v58, %v754_v33  ;;  %v776_v58 = vstv %s2051_s8  ;;  %v949_v33 = vrot.slane %v2000_v17, 1  ;;  %v963_v12 = vrot.slane %v962_v24, 1 }
 0x1ee   : > { %v510_v63 = vrot.slane %v509_v34, 1  ;;  %v694_v57 = vadd.f32 %v692_v11, %v673_v31  ;;  %v969_v29 = vmul.f32 %v968_v40, %v1717_v54  ;;  %v906_v13 = vmul.f32 %v905_v10, %v1926_v19 }
 0x1ef   : > { %v950_v11 = vsel %vm301_vm13, %v2000_v17, %v949_v33  ;;  %v964_v17 = vsel %vm316_vm14, %v962_v24, %v963_v12  ;;  %v1141_v32 = vrot.slane %v1140_v0, 1 }
 0x1f0   : > { %v511_v47 = vsel %vm316_vm14, %v509_v34, %v510_v63  ;;  %v862_v34 = vrot.slane %v1984_v56, 1  ;;  %v994_v31 = vadd.f32 %v992_v61, %v969_v29 }
 0x1f1   : > { %v513_v27 = vadd.f32 %v511_v47, %v499_v4  ;;  %v757_v4 = vadd.f32 %v755_v49, %v736_v15  ;;  %v708_v47 = vadd.f32 %v706_v55, %v694_v57  ;;  %v1097_v55 = vstv %s2096_s11 }
 0x1f2   : > { %v1098_v45 = vmul.f32 %v1097_v55, %v1717_v54 }
 0x1f3   : > { %v514_v46 = vadd.f32 %v513_v27, %v450_v60  ;;  %v863_v27 = vsel %vm279_vm12, %v1984_v56, %v862_v34  ;;  %v1057_v34 = vrot.slane %v1994_v9, 1  ;;  %v1091_v57 = vpop.permute.xlu2 %1090 }
 0x1f4   : > { %v2039_v21 = vld [vmem:[#allocation3] sm:$0x3]  ;;  %v865_v56 = vadd.f32 %v863_v27, %v840_v18 }
 0x1f5   : > { %515 = vst.msk [vmem:[#allocation3] sm:$0x7] %vm2014_vm15, %v514_v46  ;;  %v638_v22 = vpop.permute.xlu0 %637  ;;  %v777_v46 = vmul.f32 %v776_v58, %v1926_v19  ;;  %v1078_v58 = vrot.slane %v2002_v20, 1  ;;  %v1058_v27 = vsel %vm279_vm12, %v1994_v9, %v1057_v34 }
 0x1f6   : > { %v639_v30 = vrot.slane %v638_v22, 1  ;;  %v886_v36 = vadd.f32 %v884_v5, %v865_v56 }
 0x1f7   : > { %v802_v51 = vadd.f32 %v800_v62, %v777_v46  ;;  %v1092_v62 = vrot.slane %v1091_v57, 1 }
 0x1f8   : > { %v640_v8 = vsel %vm316_vm14, %v638_v22, %v639_v30  ;;  %v928_v30 = vrot.slane %v1988_v7, 1 }
 0x1f9   : > { %v642_v38 = vadd.f32 %v640_v8, %v628_v25  ;;  %v823_v25 = vadd.f32 %v821_v44, %v802_v51  ;;  %v1012_v8 = vrot.slane %v1011_v23, 1  ;;  %v1093_v54 = vsel %vm316_vm14, %v1091_v57, %v1092_v62 }
 0x1fa   : > { %v929_v39 = vsel %vm279_vm12, %v1988_v7, %v928_v30 }
 0x1fb   : > { %v643_v3 = vadd.f32 %v642_v38, %v579_v37  ;;  %v837_v42 = vadd.f32 %v835_v35, %v823_v25  ;;  %v1013_v49 = vsel %vm301_vm13, %v1011_v23, %v1012_v8  ;;  %v931_v6 = vadd.f32 %v929_v39, %v906_v13 }
 0x1fc   : > { %v2064_v43 = vld [vmem:[#allocation3] sm:$0x7]  ;;  %v1015_v50 = vadd.f32 %v1013_v49, %v994_v31  ;;  %v1079_v23 = vsel %vm301_vm13, %v2002_v20, %v1078_v58 }
 0x1fd   : > { %644 = vst.msk [vmem:[#allocation3] sm:$0x7] %vm2014_vm15, %v643_v3  ;;  %v767_v28 = vpop.permute.xlu0 %766 }
 0x1fe   : > { %v768_v63 = vrot.slane %v767_v28, 1 }
 0x200   : > { %v769_v59 = vsel %vm316_vm14, %v767_v28, %v768_v63  ;;  %v1120_v28 = vrot.slane %v1996_v48, 1  ;;  %v952_v63 = vadd.f32 %v950_v11, %v931_v6 }
 0x201   : > { %v771_v60 = vadd.f32 %v769_v59, %v757_v4  ;;  %v1034_v4 = vstv %s2099_s12 }
 0x202   : > { %v966_v59 = vadd.f32 %v964_v17, %v952_v63  ;;  %v1035_v18 = vmul.f32 %v1034_v4, %v1926_v19 }
 0x203   : > { %v772_v53 = vadd.f32 %v771_v60, %v708_v47  ;;  %v1121_v60 = vsel %vm279_vm12, %v1996_v48, %v1120_v28 }
 0x204   : > { %v2088_v22 = vld [vmem:[#allocation3] sm:$0x7]  ;;  %v1123_v5 = vadd.f32 %v1121_v60, %v1098_v45  ;;  %v1060_v56 = vadd.f32 %v1058_v27, %v1035_v18 }
 0x205   : > { %773 = vst.msk [vmem:[#allocation3] sm:$0x7] %vm2014_vm15, %v772_v53  ;;  %v896_v14 = vpop.permute.xlu0 %895  ;;  %v1142_v53 = vsel %vm301_vm13, %v1140_v0, %v1141_v32 }
 0x206   : > { %v897_v2 = vrot.slane %v896_v14, 1  ;;  %v1081_v19 = vadd.f32 %v1079_v23, %v1060_v56  ;;  %v1144_v51 = vadd.f32 %v1142_v53, %v1123_v5 }
 0x208   : > { %v898_v37 = vsel %vm316_vm14, %v896_v14, %v897_v2  ;;  %v1095_v20 = vadd.f32 %v1093_v54, %v1081_v19 }
 0x209   : > { %v900_v38 = vadd.f32 %v898_v37, %v886_v36 }
 0x20b   : > { %v901_v3 = vadd.f32 %v900_v38, %v837_v42 }
 0x20c   : > { %v774_v15 = vld [vmem:[#allocation3] sm:$0x7] }
 0x20d   : > { %1171 = vrot.lane.b32.xlu1 %v774_v15, %s1458_s13  ;;  %902 = vst.msk [vmem:[#allocation3] sm:$0x7] %vm2014_vm15, %v901_v3  ;;  %v1025_v7 = vpop.permute.xlu0 %1024 }
 0x20e   : > { %v1026_v1 = vrot.slane %v1025_v7, 1 }
 0x210   : > { %v1027_v52 = vsel %vm316_vm14, %v1025_v7, %v1026_v1 }
 0x211   : > { %v1029_v47 = vadd.f32 %v1027_v52, %v1015_v50 }
 0x213   : > { %v1030_v46 = vadd.f32 %v1029_v47, %v966_v59 }
 0x214   : > { %v903_v44 = vld [vmem:[#allocation3] sm:$0x7] }
 0x215   : > { %1163 = vrot.lane.b32.xlu1 %v2064_v43, %s1458_s13  ;;  %v1154_v48 = vpop.permute.xlu0 %1153  ;;  %1031 = vst.msk [vmem:[#allocation3] sm:$0x7] %vm2014_vm15, %v1030_v46 }
 0x216   : > { %v1155_v9 = vrot.slane %v1154_v48, 1 }
 0x218   : > { %v1156_v24 = vsel %vm316_vm14, %v1154_v48, %v1155_v9 }
 0x219   : > { %v1158_v14 = vadd.f32 %v1156_v24, %v1144_v51 }
 0x21b   : > { %v1159_v26 = vadd.f32 %v1158_v14, %v1095_v20 }
 0x21c   : > { %v1032_v30 = vld [vmem:[#allocation3] sm:$0x7] }
 0x21d   : > { %1178 = vrot.lane.b32.xlu2 %v1032_v30, %s1458_s13  ;;  %1160 = vst.msk [vmem:[#allocation3] sm:$0x7] %vm2014_vm15, %v1159_v26 }
 0x224   : > { %v1161_v43 = vld [vmem:[#allocation3] sm:$0x7] }
 0x225   : > { %1193 = vrot.lane.b32.xlu0 %v1161_v43, %s1459_s14 }
 0x277   : > { %v1179_v36 = vpop.permute.xlu2 %1178 }
 0x278   : > { %v1180_v10 = vrot.slane %v1179_v36, 1 }
 0x27a   : > { %v1181_v33 = vsel %vm1166_vm0, %v1179_v36, %v1180_v10 }
 0x27b   : > { %v1183_v41 = vadd.f32 %v1181_v33, %v903_v44 }
 0x27f   : > { %v1172_v35 = vpop.permute.xlu1 %1171 }
 0x280   : > { %v1173_v2 = vrot.slane %v1172_v35, 1 }
 0x282   : > { %v1174_v40 = vsel %vm1166_vm0, %v1172_v35, %v1173_v2 }
 0x283   : > { %v1176_v25 = vadd.f32 %v1174_v40, %v2088_v22 }
 0x285   : > { %1185 = vrot.lane.b32.xlu2 %v1176_v25, %s1459_s14 }
 0x287   : > { %v1164_v61 = vpop.permute.xlu1 %1163 }
 0x288   : > { %v1165_v12 = vrot.slane %v1164_v61, 1 }
 0x28a   : > { %v1167_v13 = vsel %vm1166_vm0, %v1164_v61, %v1165_v12 }
 0x28b   : > { %v1169_v3 = vadd.f32 %v1167_v13, %v2039_v21 }
 0x297   : > { %v1194_v8 = vpop.permute.xlu0 %1193 }
 0x298   : > { %v1195_v37 = vrot.slane %v1194_v8, 1 }
 0x29a   : > { %v1196_v42 = vsel %vm1188_vm1, %v1194_v8, %v1195_v37 }
 0x29b   : > { %v1198_v38 = vadd.f32 %v1196_v42, %v1183_v41 }
 0x29d   : > { %1200 = vrot.lane.b32.xlu0 %v1198_v38, %s1460_s15 }
 0x2df   : > { %v1186_v39 = vpop.permute.xlu2 %1185 }
 0x2e0   : > { %v1187_v29 = vrot.slane %v1186_v39, 1 }
 0x2e2   : > { %v1189_v22 = vsel %vm1188_vm1, %v1186_v39, %v1187_v29 }
 0x2e3   : > { %v1191_v15 = vadd.f32 %v1189_v22, %v1169_v3 }
 0x30f   : > { %v1201_v11 = vpop.permute.xlu0 %1200 }
 0x310   : > { %v1202_v49 = vrot.slane %v1201_v11, 1 }
 0x312   : > { %v1204_v31 = vsel %vm1203_vm2, %v1201_v11, %v1202_v49 }
 0x313   : > { %v1206_v6 = vadd.f32 %v1204_v31, %v1191_v15 }
 0x315   : > { %v1395_v0 = vmul.f32 -1.442695, %v1206_v6 }
 0x317   : > { %1421 = vpow2.f32 %v1395_v0 }
 0x31d   : > { %v1422_v7 = vpop.eup %1421 }
 0x31e   : > { %v1210_v28 = vadd.f32 1.0, %v1422_v7 }
 0x320   : > { %1423 = vrcp.f32 %v1210_v28  ;;  %v1222_v55 = vand.u32 2147483648, %v1210_v28  ;;  %v1220_v21 = vand.u32 2147483647, %v1210_v28  ;;  %vm1216_vm4 = vweird.f32 %v1210_v28 }
 0x322   : > { %v1223_v57 = vor.u32 1.1754944e-38, %v1222_v55  ;;  %vm1221_vm7 = vcmp.eq.f32.partialorder %v1220_v21, 8.507059e+37 }
 0x326   : > { %v1424_v34 = vpop.eup %1423 }
 0x327   : > { %v1212_v17 = vmul.f32 %v1424_v34, %v1210_v28  ;;  %vm1217_vm3 = vweird.f32 %v1424_v34 }
 0x328   : > { %vm1218_vm6 = vmor %vm1216_vm4, %vm1217_vm3 }
 0x329   : > { %v1213_v1 = vsub.f32 1.0, %v1212_v17 }
 0x32b   : > { %v1214_v63 = vmul.f32 %v1424_v34, %v1213_v1 }
 0x32d   : > { %v1215_v50 = vadd.f32 %v1424_v34, %v1214_v63 }
 0x32f   : > { %v1219_v4 = vsel %vm1218_vm6, %v1424_v34, %v1215_v50 }
 0x330   : > { %v1224_v58 = vsel %vm1221_vm7, %v1223_v57, %v1219_v4 }
 0x331   : > { %1228 = vst.msk [vmem:[%s150_s20] sm:$0x3] %vm1226_vm5, %v1224_v58 }
 0x332 PF: > { %s21_s16 = sadd.s32 1, %s1445_s16  }
 0x333   : > { %p18_p4 = scmp.ge.s32.totalorder %s21_s16, 4  }
 0x335   :  { %20 = sbr.rel (!%p18_p4) target bundleno = 7 (0x7), region = 67 }

</bundles_post_ra>
